<compile_context>
chip_gen: v7x
topology: tpu7x:2x2x1
jax: 0.10.0
libtpu: 0.0.40
codegen_flags: <defaults>
</compile_context>

<pallas_src>
import math
from functools import partial

import jax
import jax.numpy as jnp
from jax.experimental import pallas as pl
from jax.experimental.pallas import tpu as pltpu

VMEM_SPEC = pl.BlockSpec(memory_space=pltpu.MemorySpace.VMEM)

# Fused gate-column order (each block is Hd lanes wide):
#   [ i_f, i_b, f_f, f_b, o_f, o_b, g_f, g_b ]
# -> sigmoid gates occupy one contiguous 6*Hd lane range, tanh gates another 2*Hd
#    range, and the fused cell/hidden state is simply [fwd | bwd] of width 2*Hd = E.
_GATE_ORDER = (('i', 'f'), ('i', 'b'), ('f', 'f'), ('f', 'b'),
               ('o', 'f'), ('o', 'b'), ('g', 'f'), ('g', 'b'))
_PT_GATE_IDX = {'i': 0, 'f': 1, 'g': 2, 'o': 3}   # PyTorch LSTM row-block order


def _slab_offsets(E):
    off_b = 2 * E              # fused bias row (section padded to 8 rows)
    off_hh = off_b + 8         # block-diagonal recurrent weight (E rows)
    off_qkv = off_hh + E       # fused QKV projection (E rows, 3E cols used)
    off_o = off_qkv + E        # output projection (E rows, E cols used)
    rows = off_o + E
    return off_b, off_hh, off_qkv, off_o, rows


# ------------------------------ fused kernel ------------------------------
def _abl_kernel(x2_ref, w_ref, o_ref, *, num_heads):
    x2 = x2_ref[...]                       # (T, B, 2E) time-major: [x(t) | x(T-1-t)]
    T, B, two_e = x2.shape
    E = two_e // 2
    Hd = E // 2
    nh = num_heads
    dh = E // nh
    off_b, off_hh, off_qkv, off_o, _ = _slab_offsets(E)

    # Static, 8-row-aligned slices of the single resident weight slab.
    w_x2 = w_ref[0:2 * E, :]                      # (2E, 4E) input proj, both dirs
    bias = w_ref[off_b:off_b + 1, :]              # (1, 4E)  folded b_ih + b_hh
    whh = w_ref[off_hh:off_hh + E, :]             # (E, 4E)  block-diag recurrent W
    wqkv = w_ref[off_qkv:off_qkv + E, 0:3 * E]    # (E, 3E)
    wo = w_ref[off_o:off_o + E, 0:E]              # (E, E)

    # ---------------- bidirectional LSTM ----------------
    # One lane-dense matmul for the input projections of both directions,
    # already time-aligned per loop step: gx[s] carries forward gates for time s
    # and backward gates for time T-1-s.
    gx = jnp.einsum('tbe,ef->tbf', x2, w_x2,
                    preferred_element_type=jnp.float32) + bias      # (T, B, 4E)

    h = jnp.zeros((B, E), jnp.float32)     # fused hidden  [h_fwd | h_bwd]
    c = jnp.zeros((B, E), jnp.float32)     # fused cell    [c_fwd | c_bwd]
    hs = []
    # Static unroll: the recurrence is inherently serial.  Each step is ONE
    # (B,E) x (E,4E) matmul, one (B,4E) add, 2 grouped activations and a few
    # (B,E)-wide VPU ops.  No scratch stores.
    for s in range(T):
        g = gx[s] + jnp.dot(h, whh, preferred_element_type=jnp.float32)  # (B, 4E)
        sg = jax.nn.sigmoid(g[:, 0:6 * Hd])       # [i_f, i_b, f_f, f_b, o_f, o_b]
        tg = jnp.tanh(g[:, 6 * Hd:8 * Hd])        # [g_f, g_b]
        i_gate = sg[:, 0:2 * Hd]
        f_gate = sg[:, 2 * Hd:4 * Hd]
        o_gate = sg[:, 4 * Hd:6 * Hd]
        c = f_gate * c + i_gate * tg
        h = o_gate * jnp.tanh(c)
        hs.append(h)

    # LSTM output, batch-major (B, T, E): forward half in step order, backward
    # half time-reversed via Python-level list reversal (no lax.rev, no scratch).
    h_all = jnp.stack(hs, axis=1)                    # (B, T, E)
    h_all_rev = jnp.stack(hs[::-1], axis=1)          # (B, T, E)
    xl = jnp.concatenate([h_all[:, :, 0:Hd], h_all_rev[:, :, Hd:E]], axis=-1)

    # ---------------- multi-head attention ----------------
    qkv = jnp.einsum('bte,ef->btf', xl, wqkv,
                     preferred_element_type=jnp.float32)            # (B, T, 3E)
    q = qkv[..., 0:E]
    k = qkv[..., E:2 * E]
    v = qkv[..., 2 * E:3 * E]

    def split_heads(z):                    # (B, T, E) -> (nh*B, T, dh), head-major
        return jnp.concatenate(
            [z[:, :, hh * dh:(hh + 1) * dh] for hh in range(nh)], axis=0)

    qh = split_heads(q)
    kh = split_heads(k)
    vh = split_heads(v)

    scores = jnp.einsum('nqd,nkd->nqk', qh, kh,
                        preferred_element_type=jnp.float32) * (1.0 / math.sqrt(dh))

    # Reference applies F.softmax(scores, dim=0): normalise over the flattened
    # (batch*head) axis.  Head-major ordering of that axis is applied consistently
    # to attn and vh, so the result matches the batch-major PyTorch layout.
    m = jnp.max(scores, axis=0, keepdims=True)
    p = jnp.exp(scores - m)
    attn = p * pl.reciprocal(jnp.sum(p, axis=0, keepdims=True), approx=True)
    # TODO(synk): dropout on `attn` is eval-mode identity.

    ctx = jnp.einsum('nqk,nkd->nqd', attn, vh,
                     preferred_element_type=jnp.float32)            # (nh*B, T, dh)
    merged = jnp.concatenate(
        [ctx[hh * B:(hh + 1) * B] for hh in range(nh)], axis=-1)    # (B, T, E)

    o_ref[...] = jnp.einsum('bte,ef->btf', merged, wo,
                            preferred_element_type=jnp.float32)


# ------------------------------ host-side weight packing ------------------------------
def _pack_kernel_params(p):
    """Pack all PyTorch-layout weights into ONE 128-lane, 8-row-aligned f32 slab."""
    E = p['wq'].shape[0]
    Hd = E // 2
    G = 4 * E                                       # fused gate width (= 128 at E=32)
    off_b, off_hh, off_qkv, off_o, rows = _slab_offsets(E)

    w_ih = {'f': p['w_ih_f'], 'b': p['w_ih_b']}
    w_hh = {'f': p['w_hh_f'], 'b': p['w_hh_b']}
    bsum = {'f': p['b_ih_f'] + p['b_hh_f'], 'b': p['b_ih_b'] + p['b_hh_b']}

    slab = jnp.zeros((rows, G), jnp.float32)
    for j, (gate, d) in enumerate(_GATE_ORDER):
        gi = _PT_GATE_IDX[gate]
        col = slice(j * Hd, (j + 1) * Hd)
        # Input projection: rows 0:E act on x(t) (fwd), rows E:2E on x(T-1-t) (bwd).
        r0 = 0 if d == 'f' else E
        slab = slab.at[r0:r0 + E, col].set(w_ih[d][gi * Hd:(gi + 1) * Hd, :].T)
        # Folded bias row.
        slab = slab.at[off_b, col].set(bsum[d][gi * Hd:(gi + 1) * Hd])
        # Block-diagonal recurrent weight: rows 0:Hd from h_f, rows Hd:2Hd from h_b.
        rh = off_hh + (0 if d == 'f' else Hd)
        slab = slab.at[rh:rh + Hd, col].set(w_hh[d][gi * Hd:(gi + 1) * Hd, :].T)

    w_qkv_t = jnp.concatenate([p['wq'], p['wk'], p['wv']], axis=0).T   # (E, 3E)
    slab = slab.at[off_qkv:off_qkv + E, 0:3 * E].set(w_qkv_t)
    slab = slab.at[off_o:off_o + E, 0:E].set(p['wo'].T)
    return slab


# ------------------------------ wrapper ------------------------------
@partial(jax.jit, static_argnames=('num_heads',))
def attention_bottleneck_lstm(x, params, *, num_heads):
    B, T, E = x.shape
    Hd = E // 2
    G = 4 * E
    dh = E // num_heads
    nh = num_heads

    slab = _pack_kernel_params(params)              # (5E+8, 4E) single weight slab
    x_tm = jnp.transpose(x, (1, 0, 2))              # time-major (T, B, E) — free at 4 KB
    x2 = jnp.concatenate([x_tm, x_tm[::-1]], axis=-1)   # (T, B, 2E): [x(t) | x(T-1-t)]

    cost = pl.CostEstimate(
        flops=(2 * T * B * (2 * E) * G          # LSTM input projection
               + 2 * T * B * E * G              # fused recurrent matmuls
               + 2 * B * T * E * (3 * E)        # QKV projection
               + 2 * (nh * B) * T * T * dh * 2  # scores + context
               + 2 * B * T * E * E),            # output projection
        transcendentals=T * B * (8 * Hd + E) + (nh * B) * T * T,
        bytes_accessed=4 * (x2.size + slab.size + B * T * E),
    )

    return pl.pallas_call(
        partial(_abl_kernel, num_heads=num_heads),
        out_shape=jax.ShapeDtypeStruct((B, T, E), jnp.float32),
        in_specs=[VMEM_SPEC, VMEM_SPEC],
        out_specs=VMEM_SPEC,
        cost_estimate=cost,
    )(x2, slab)


# ------------------------------ pure-JAX reference ------------------------------
def reference_forward(x, p, num_heads):
    """Straightforward JAX mirror of the PyTorch module (float32)."""
    B, T, E = x.shape
    Hd = E // 2
    dh = E // num_heads

    def run_dir(xs, w_ih, w_hh, b_ih, b_hh):
        h = jnp.zeros((B, Hd), jnp.float32)
        c = jnp.zeros((B, Hd), jnp.float32)
        hs = []
        for t in range(T):
            g = xs[:, t, :] @ w_ih.T + b_ih + h @ w_hh.T + b_hh
            i = jax.nn.sigmoid(g[:, 0:Hd])
            f = jax.nn.sigmoid(g[:, Hd:2 * Hd])
            gg = jnp.tanh(g[:, 2 * Hd:3 * Hd])
            o = jax.nn.sigmoid(g[:, 3 * Hd:4 * Hd])
            c = f * c + i * gg
            h = o * jnp.tanh(c)
            hs.append(h)
        return jnp.stack(hs, axis=1)                                      # (B, T, Hd)

    hf = run_dir(x, p['w_ih_f'], p['w_hh_f'], p['b_ih_f'], p['b_hh_f'])
    hb = run_dir(x[:, ::-1, :], p['w_ih_b'], p['w_hh_b'],
                 p['b_ih_b'], p['b_hh_b'])[:, ::-1, :]
    xl = jnp.concatenate([hf, hb], axis=-1)                               # (B, T, E)

    q = xl @ p['wq'].T
    k = xl @ p['wk'].T
    v = xl @ p['wv'].T

    def t_qkv(z):                                                         # transpose_qkv
        z = z.reshape(B, T, num_heads, dh).transpose(0, 2, 1, 3)
        return z.reshape(B * num_heads, T, dh)

    qh, kh, vh = t_qkv(q), t_qkv(k), t_qkv(v)
    scores = jnp.einsum('nqd,nkd->nqk', qh, kh) / math.sqrt(dh)
    attn = jax.nn.softmax(scores, axis=0)                                 # dim=0 (!)
    ctx = jnp.einsum('nqk,nkd->nqd', attn, vh)
    ctx = ctx.reshape(B, num_heads, T, dh).transpose(0, 2, 1, 3).reshape(B, T, E)
    return ctx @ p['wo'].T


# ------------------------------ parameter init ------------------------------
def init_params(key, num_hiddens):
    E = num_hiddens
    Hd = E // 2
    ks = iter(jax.random.split(key, 16))

    def uni(shape, bound):
        return jax.random.uniform(next(ks), shape, jnp.float32, -bound, bound)

    kl = 1.0 / math.sqrt(Hd)            # PyTorch LSTM init bound
    ka = 1.0 / math.sqrt(E)             # PyTorch Linear init bound
    return dict(
        w_ih_f=uni((4 * Hd, E), kl), w_hh_f=uni((4 * Hd, Hd), kl),
        b_ih_f=uni((4 * Hd,), kl), b_hh_f=uni((4 * Hd,), kl),
        w_ih_b=uni((4 * Hd, E), kl), w_hh_b=uni((4 * Hd, Hd), kl),
        b_ih_b=uni((4 * Hd,), kl), b_hh_b=uni((4 * Hd,), kl),
        wq=uni((E, E), ka), wk=uni((E, E), ka),
        wv=uni((E, E), ka), wo=uni((E, E), ka),
    )


if __name__ == "__main__":
    B, T = 2, 16
    num_hiddens = 32
    num_heads = 4
    dropout = 0.1   # eval mode -> identity

    key = jax.random.PRNGKey(0)
    kx, kp = jax.random.split(key)
    x = jax.random.normal(kx, (B, T, num_hiddens), dtype=jnp.float32)
    params = init_params(kp, num_hiddens)

    out = attention_bottleneck_lstm(x, params, num_heads=num_heads)
    out = jax.block_until_ready(out)

    assert out.shape == (B, T, num_hiddens)
    assert bool(jnp.all(jnp.isfinite(out)))

    ref = reference_forward(x, params, num_heads)
    err = float(jnp.max(jnp.abs(out - ref)))
    assert err < 2e-2, f"kernel/reference mismatch: max |diff| = {err}"

    print("KERNEL_OK")
</pallas_src>

<mosaic_0001>
module attributes {stable_mosaic.version = 11 : i64} {
  func.func @_abl_kernel(%arg0: memref<16x2x64xf32, #tpu.memory_space<vmem>>, %arg1: memref<168x128xf32, #tpu.memory_space<vmem>>, %arg2: memref<2x16x32xf32, #tpu.memory_space<vmem>>) attributes {dimension_semantics = [], scalar_prefetch = 0 : i64, scratch_operands = 0 : i64, tpu.core_type = #tpu.core_type<tc>} {
    %c0 = arith.constant 0 : index
    %c0_0 = arith.constant 0 : index
    %c0_1 = arith.constant 0 : index
    %0 = vector.load %arg0[%c0, %c0_0, %c0_1] : memref<16x2x64xf32, #tpu.memory_space<vmem>>, vector<16x2x64xf32>
    %c0_2 = arith.constant 0 : index
    %c0_3 = arith.constant 0 : index
    %1 = vector.load %arg1[%c0_2, %c0_3] : memref<168x128xf32, #tpu.memory_space<vmem>>, vector<64x128xf32>
    %c64 = arith.constant 64 : index
    %c0_4 = arith.constant 0 : index
    %2 = vector.load %arg1[%c64, %c0_4] : memref<168x128xf32, #tpu.memory_space<vmem>>, vector<1x128xf32>
    %c72 = arith.constant 72 : index
    %c0_5 = arith.constant 0 : index
    %3 = vector.load %arg1[%c72, %c0_5] : memref<168x128xf32, #tpu.memory_space<vmem>>, vector<32x128xf32>
    %c104 = arith.constant 104 : index
    %c0_6 = arith.constant 0 : index
    %4 = vector.load %arg1[%c104, %c0_6] : memref<168x128xf32, #tpu.memory_space<vmem>>, vector<32x96xf32>
    %c136 = arith.constant 136 : index
    %c0_7 = arith.constant 0 : index
    %5 = vector.load %arg1[%c136, %c0_7] : memref<168x128xf32, #tpu.memory_space<vmem>>, vector<32x32xf32>
    "tpu.trace_start"() <{level = 10 : i32, message = "tbe,ef->tbf"}> : () -> ()
    %cst = arith.constant dense<0.000000e+00> : vector<16x2x128xf32>
    %6 = tpu.matmul %0, %1, %cst {dimension_numbers = #tpu.dot_dimension_numbers<[2], [0], [0, 1], [1], [0, 0, 0, 1, 1, 1], [], []>} : vector<16x2x64xf32>, vector<64x128xf32>, vector<16x2x128xf32> -> vector<16x2x128xf32>
    "tpu.trace_stop"() : () -> ()
    %7 = vector.shape_cast %2 : vector<1x128xf32> to vector<1x1x128xf32>
    %8 = vector.broadcast %7 : vector<1x1x128xf32> to vector<16x2x128xf32>
    %9 = arith.addf %6, %8 : vector<16x2x128xf32>
    %cst_8 = arith.constant 0.000000e+00 : f32
    %10 = vector.broadcast %cst_8 : f32 to vector<2x32xf32>
    %cst_9 = arith.constant 0.000000e+00 : f32
    %11 = vector.broadcast %cst_9 : f32 to vector<2x32xf32>
    %12 = vector.extract_strided_slice %9 {offsets = [0, 0, 0], sizes = [1, 2, 128], strides = [1, 1, 1]} : vector<16x2x128xf32> to vector<1x2x128xf32>
    %13 = vector.shape_cast %12 : vector<1x2x128xf32> to vector<2x128xf32>
    %cst_10 = arith.constant dense<0.000000e+00> : vector<2x128xf32>
    %14 = tpu.matmul %10, %3, %cst_10 {dimension_numbers = #tpu.dot_dimension_numbers<[1], [0], [0], [1], [0, 0, 1, 1], [], []>} : vector<2x32xf32>, vector<32x128xf32>, vector<2x128xf32> -> vector<2x128xf32>
    %15 = arith.addf %13, %14 : vector<2x128xf32>
    %16 = vector.extract_strided_slice %15 {offsets = [0, 0], sizes = [2, 96], strides = [1, 1]} : vector<2x128xf32> to vector<2x96xf32>
    %17 = arith.negf %16 : vector<2x96xf32>
    %18 = math.exp %17 : vector<2x96xf32>
    %cst_11 = arith.constant 1.000000e+00 : f32
    %19 = vector.broadcast %cst_11 : f32 to vector<2x96xf32>
    %20 = arith.addf %19, %18 : vector<2x96xf32>
    %21 = arith.divf %19, %20 : vector<2x96xf32>
    %22 = vector.extract_strided_slice %15 {offsets = [0, 96], sizes = [2, 32], strides = [1, 1]} : vector<2x128xf32> to vector<2x32xf32>
    %23 = math.tanh %22 : vector<2x32xf32>
    %24 = vector.extract_strided_slice %21 {offsets = [0, 0], sizes = [2, 32], strides = [1, 1]} : vector<2x96xf32> to vector<2x32xf32>
    %25 = vector.extract_strided_slice %21 {offsets = [0, 32], sizes = [2, 32], strides = [1, 1]} : vector<2x96xf32> to vector<2x32xf32>
    %26 = vector.extract_strided_slice %21 {offsets = [0, 64], sizes = [2, 32], strides = [1, 1]} : vector<2x96xf32> to vector<2x32xf32>
    %27 = arith.mulf %25, %11 : vector<2x32xf32>
    %28 = arith.mulf %24, %23 : vector<2x32xf32>
    %29 = arith.addf %27, %28 : vector<2x32xf32>
    %30 = math.tanh %29 : vector<2x32xf32>
    %31 = arith.mulf %26, %30 : vector<2x32xf32>
    %32 = vector.extract_strided_slice %9 {offsets = [1, 0, 0], sizes = [1, 2, 128], strides = [1, 1, 1]} : vector<16x2x128xf32> to vector<1x2x128xf32>
    %33 = vector.shape_cast %32 : vector<1x2x128xf32> to vector<2x128xf32>
    %cst_12 = arith.constant dense<0.000000e+00> : vector<2x128xf32>
    %34 = tpu.matmul %31, %3, %cst_12 {dimension_numbers = #tpu.dot_dimension_numbers<[1], [0], [0], [1], [0, 0, 1, 1], [], []>} : vector<2x32xf32>, vector<32x128xf32>, vector<2x128xf32> -> vector<2x128xf32>
    %35 = arith.addf %33, %34 : vector<2x128xf32>
    %36 = vector.extract_strided_slice %35 {offsets = [0, 0], sizes = [2, 96], strides = [1, 1]} : vector<2x128xf32> to vector<2x96xf32>
    %37 = arith.negf %36 : vector<2x96xf32>
    %38 = math.exp %37 : vector<2x96xf32>
    %cst_13 = arith.constant 1.000000e+00 : f32
    %39 = vector.broadcast %cst_13 : f32 to vector<2x96xf32>
    %40 = arith.addf %39, %38 : vector<2x96xf32>
    %41 = arith.divf %39, %40 : vector<2x96xf32>
    %42 = vector.extract_strided_slice %35 {offsets = [0, 96], sizes = [2, 32], strides = [1, 1]} : vector<2x128xf32> to vector<2x32xf32>
    %43 = math.tanh %42 : vector<2x32xf32>
    %44 = vector.extract_strided_slice %41 {offsets = [0, 0], sizes = [2, 32], strides = [1, 1]} : vector<2x96xf32> to vector<2x32xf32>
    %45 = vector.extract_strided_slice %41 {offsets = [0, 32], sizes = [2, 32], strides = [1, 1]} : vector<2x96xf32> to vector<2x32xf32>
    %46 = vector.extract_strided_slice %41 {offsets = [0, 64], sizes = [2, 32], strides = [1, 1]} : vector<2x96xf32> to vector<2x32xf32>
    %47 = arith.mulf %45, %29 : vector<2x32xf32>
    %48 = arith.mulf %44, %43 : vector<2x32xf32>
    %49 = arith.addf %47, %48 : vector<2x32xf32>
    %50 = math.tanh %49 : vector<2x32xf32>
    %51 = arith.mulf %46, %50 : vector<2x32xf32>
    %52 = vector.extract_strided_slice %9 {offsets = [2, 0, 0], sizes = [1, 2, 128], strides = [1, 1, 1]} : vector<16x2x128xf32> to vector<1x2x128xf32>
    %53 = vector.shape_cast %52 : vector<1x2x128xf32> to vector<2x128xf32>
    %cst_14 = arith.constant dense<0.000000e+00> : vector<2x128xf32>
    %54 = tpu.matmul %51, %3, %cst_14 {dimension_numbers = #tpu.dot_dimension_numbers<[1], [0], [0], [1], [0, 0, 1, 1], [], []>} : vector<2x32xf32>, vector<32x128xf32>, vector<2x128xf32> -> vector<2x128xf32>
    %55 = arith.addf %53, %54 : vector<2x128xf32>
    %56 = vector.extract_strided_slice %55 {offsets = [0, 0], sizes = [2, 96], strides = [1, 1]} : vector<2x128xf32> to vector<2x96xf32>
    %57 = arith.negf %56 : vector<2x96xf32>
    %58 = math.exp %57 : vector<2x96xf32>
    %cst_15 = arith.constant 1.000000e+00 : f32
    %59 = vector.broadcast %cst_15 : f32 to vector<2x96xf32>
    %60 = arith.addf %59, %58 : vector<2x96xf32>
    %61 = arith.divf %59, %60 : vector<2x96xf32>
    %62 = vector.extract_strided_slice %55 {offsets = [0, 96], sizes = [2, 32], strides = [1, 1]} : vector<2x128xf32> to vector<2x32xf32>
    %63 = math.tanh %62 : vector<2x32xf32>
    %64 = vector.extract_strided_slice %61 {offsets = [0, 0], sizes = [2, 32], strides = [1, 1]} : vector<2x96xf32> to vector<2x32xf32>
    %65 = vector.extract_strided_slice %61 {offsets = [0, 32], sizes = [2, 32], strides = [1, 1]} : vector<2x96xf32> to vector<2x32xf32>
    %66 = vector.extract_strided_slice %61 {offsets = [0, 64], sizes = [2, 32], strides = [1, 1]} : vector<2x96xf32> to vector<2x32xf32>
    %67 = arith.mulf %65, %49 : vector<2x32xf32>
    %68 = arith.mulf %64, %63 : vector<2x32xf32>
    %69 = arith.addf %67, %68 : vector<2x32xf32>
    %70 = math.tanh %69 : vector<2x32xf32>
    %71 = arith.mulf %66, %70 : vector<2x32xf32>
    %72 = vector.extract_strided_slice %9 {offsets = [3, 0, 0], sizes = [1, 2, 128], strides = [1, 1, 1]} : vector<16x2x128xf32> to vector<1x2x128xf32>
    %73 = vector.shape_cast %72 : vector<1x2x128xf32> to vector<2x128xf32>
    %cst_16 = arith.constant dense<0.000000e+00> : vector<2x128xf32>
    %74 = tpu.matmul %71, %3, %cst_16 {dimension_numbers = #tpu.dot_dimension_numbers<[1], [0], [0], [1], [0, 0, 1, 1], [], []>} : vector<2x32xf32>, vector<32x128xf32>, vector<2x128xf32> -> vector<2x128xf32>
    %75 = arith.addf %73, %74 : vector<2x128xf32>
    %76 = vector.extract_strided_slice %75 {offsets = [0, 0], sizes = [2, 96], strides = [1, 1]} : vector<2x128xf32> to vector<2x96xf32>
    %77 = arith.negf %76 : vector<2x96xf32>
    %78 = math.exp %77 : vector<2x96xf32>
    %cst_17 = arith.constant 1.000000e+00 : f32
    %79 = vector.broadcast %cst_17 : f32 to vector<2x96xf32>
    %80 = arith.addf %79, %78 : vector<2x96xf32>
    %81 = arith.divf %79, %80 : vector<2x96xf32>
    %82 = vector.extract_strided_slice %75 {offsets = [0, 96], sizes = [2, 32], strides = [1, 1]} : vector<2x128xf32> to vector<2x32xf32>
    %83 = math.tanh %82 : vector<2x32xf32>
    %84 = vector.extract_strided_slice %81 {offsets = [0, 0], sizes = [2, 32], strides = [1, 1]} : vector<2x96xf32> to vector<2x32xf32>
    %85 = vector.extract_strided_slice %81 {offsets = [0, 32], sizes = [2, 32], strides = [1, 1]} : vector<2x96xf32> to vector<2x32xf32>
    %86 = vector.extract_strided_slice %81 {offsets = [0, 64], sizes = [2, 32], strides = [1, 1]} : vector<2x96xf32> to vector<2x32xf32>
    %87 = arith.mulf %85, %69 : vector<2x32xf32>
    %88 = arith.mulf %84, %83 : vector<2x32xf32>
    %89 = arith.addf %87, %88 : vector<2x32xf32>
    %90 = math.tanh %89 : vector<2x32xf32>
    %91 = arith.mulf %86, %90 : vector<2x32xf32>
    %92 = vector.extract_strided_slice %9 {offsets = [4, 0, 0], sizes = [1, 2, 128], strides = [1, 1, 1]} : vector<16x2x128xf32> to vector<1x2x128xf32>
    %93 = vector.shape_cast %92 : vector<1x2x128xf32> to vector<2x128xf32>
    %cst_18 = arith.constant dense<0.000000e+00> : vector<2x128xf32>
    %94 = tpu.matmul %91, %3, %cst_18 {dimension_numbers = #tpu.dot_dimension_numbers<[1], [0], [0], [1], [0, 0, 1, 1], [], []>} : vector<2x32xf32>, vector<32x128xf32>, vector<2x128xf32> -> vector<2x128xf32>
    %95 = arith.addf %93, %94 : vector<2x128xf32>
    %96 = vector.extract_strided_slice %95 {offsets = [0, 0], sizes = [2, 96], strides = [1, 1]} : vector<2x128xf32> to vector<2x96xf32>
    %97 = arith.negf %96 : vector<2x96xf32>
    %98 = math.exp %97 : vector<2x96xf32>
    %cst_19 = arith.constant 1.000000e+00 : f32
    %99 = vector.broadcast %cst_19 : f32 to vector<2x96xf32>
    %100 = arith.addf %99, %98 : vector<2x96xf32>
    %101 = arith.divf %99, %100 : vector<2x96xf32>
    %102 = vector.extract_strided_slice %95 {offsets = [0, 96], sizes = [2, 32], strides = [1, 1]} : vector<2x128xf32> to vector<2x32xf32>
    %103 = math.tanh %102 : vector<2x32xf32>
    %104 = vector.extract_strided_slice %101 {offsets = [0, 0], sizes = [2, 32], strides = [1, 1]} : vector<2x96xf32> to vector<2x32xf32>
    %105 = vector.extract_strided_slice %101 {offsets = [0, 32], sizes = [2, 32], strides = [1, 1]} : vector<2x96xf32> to vector<2x32xf32>
    %106 = vector.extract_strided_slice %101 {offsets = [0, 64], sizes = [2, 32], strides = [1, 1]} : vector<2x96xf32> to vector<2x32xf32>
    %107 = arith.mulf %105, %89 : vector<2x32xf32>
    %108 = arith.mulf %104, %103 : vector<2x32xf32>
    %109 = arith.addf %107, %108 : vector<2x32xf32>
    %110 = math.tanh %109 : vector<2x32xf32>
    %111 = arith.mulf %106, %110 : vector<2x32xf32>
    %112 = vector.extract_strided_slice %9 {offsets = [5, 0, 0], sizes = [1, 2, 128], strides = [1, 1, 1]} : vector<16x2x128xf32> to vector<1x2x128xf32>
    %113 = vector.shape_cast %112 : vector<1x2x128xf32> to vector<2x128xf32>
    %cst_20 = arith.constant dense<0.000000e+00> : vector<2x128xf32>
    %114 = tpu.matmul %111, %3, %cst_20 {dimension_numbers = #tpu.dot_dimension_numbers<[1], [0], [0], [1], [0, 0, 1, 1], [], []>} : vector<2x32xf32>, vector<32x128xf32>, vector<2x128xf32> -> vector<2x128xf32>
    %115 = arith.addf %113, %114 : vector<2x128xf32>
    %116 = vector.extract_strided_slice %115 {offsets = [0, 0], sizes = [2, 96], strides = [1, 1]} : vector<2x128xf32> to vector<2x96xf32>
    %117 = arith.negf %116 : vector<2x96xf32>
    %118 = math.exp %117 : vector<2x96xf32>
    %cst_21 = arith.constant 1.000000e+00 : f32
    %119 = vector.broadcast %cst_21 : f32 to vector<2x96xf32>
    %120 = arith.addf %119, %118 : vector<2x96xf32>
    %121 = arith.divf %119, %120 : vector<2x96xf32>
    %122 = vector.extract_strided_slice %115 {offsets = [0, 96], sizes = [2, 32], strides = [1, 1]} : vector<2x128xf32> to vector<2x32xf32>
    %123 = math.tanh %122 : vector<2x32xf32>
    %124 = vector.extract_strided_slice %121 {offsets = [0, 0], sizes = [2, 32], strides = [1, 1]} : vector<2x96xf32> to vector<2x32xf32>
    %125 = vector.extract_strided_slice %121 {offsets = [0, 32], sizes = [2, 32], strides = [1, 1]} : vector<2x96xf32> to vector<2x32xf32>
    %126 = vector.extract_strided_slice %121 {offsets = [0, 64], sizes = [2, 32], strides = [1, 1]} : vector<2x96xf32> to vector<2x32xf32>
    %127 = arith.mulf %125, %109 : vector<2x32xf32>
    %128 = arith.mulf %124, %123 : vector<2x32xf32>
    %129 = arith.addf %127, %128 : vector<2x32xf32>
    %130 = math.tanh %129 : vector<2x32xf32>
    %131 = arith.mulf %126, %130 : vector<2x32xf32>
    %132 = vector.extract_strided_slice %9 {offsets = [6, 0, 0], sizes = [1, 2, 128], strides = [1, 1, 1]} : vector<16x2x128xf32> to vector<1x2x128xf32>
    %133 = vector.shape_cast %132 : vector<1x2x128xf32> to vector<2x128xf32>
    %cst_22 = arith.constant dense<0.000000e+00> : vector<2x128xf32>
    %134 = tpu.matmul %131, %3, %cst_22 {dimension_numbers = #tpu.dot_dimension_numbers<[1], [0], [0], [1], [0, 0, 1, 1], [], []>} : vector<2x32xf32>, vector<32x128xf32>, vector<2x128xf32> -> vector<2x128xf32>
    %135 = arith.addf %133, %134 : vector<2x128xf32>
    %136 = vector.extract_strided_slice %135 {offsets = [0, 0], sizes = [2, 96], strides = [1, 1]} : vector<2x128xf32> to vector<2x96xf32>
    %137 = arith.negf %136 : vector<2x96xf32>
    %138 = math.exp %137 : vector<2x96xf32>
    %cst_23 = arith.constant 1.000000e+00 : f32
    %139 = vector.broadcast %cst_23 : f32 to vector<2x96xf32>
    %140 = arith.addf %139, %138 : vector<2x96xf32>
    %141 = arith.divf %139, %140 : vector<2x96xf32>
    %142 = vector.extract_strided_slice %135 {offsets = [0, 96], sizes = [2, 32], strides = [1, 1]} : vector<2x128xf32> to vector<2x32xf32>
    %143 = math.tanh %142 : vector<2x32xf32>
    %144 = vector.extract_strided_slice %141 {offsets = [0, 0], sizes = [2, 32], strides = [1, 1]} : vector<2x96xf32> to vector<2x32xf32>
    %145 = vector.extract_strided_slice %141 {offsets = [0, 32], sizes = [2, 32], strides = [1, 1]} : vector<2x96xf32> to vector<2x32xf32>
    %146 = vector.extract_strided_slice %141 {offsets = [0, 64], sizes = [2, 32], strides = [1, 1]} : vector<2x96xf32> to vector<2x32xf32>
    %147 = arith.mulf %145, %129 : vector<2x32xf32>
    %148 = arith.mulf %144, %143 : vector<2x32xf32>
    %149 = arith.addf %147, %148 : vector<2x32xf32>
    %150 = math.tanh %149 : vector<2x32xf32>
    %151 = arith.mulf %146, %150 : vector<2x32xf32>
    %152 = vector.extract_strided_slice %9 {offsets = [7, 0, 0], sizes = [1, 2, 128], strides = [1, 1, 1]} : vector<16x2x128xf32> to vector<1x2x128xf32>
    %153 = vector.shape_cast %152 : vector<1x2x128xf32> to vector<2x128xf32>
    %cst_24 = arith.constant dense<0.000000e+00> : vector<2x128xf32>
    %154 = tpu.matmul %151, %3, %cst_24 {dimension_numbers = #tpu.dot_dimension_numbers<[1], [0], [0], [1], [0, 0, 1, 1], [], []>} : vector<2x32xf32>, vector<32x128xf32>, vector<2x128xf32> -> vector<2x128xf32>
    %155 = arith.addf %153, %154 : vector<2x128xf32>
    %156 = vector.extract_strided_slice %155 {offsets = [0, 0], sizes = [2, 96], strides = [1, 1]} : vector<2x128xf32> to vector<2x96xf32>
    %157 = arith.negf %156 : vector<2x96xf32>
    %158 = math.exp %157 : vector<2x96xf32>
    %cst_25 = arith.constant 1.000000e+00 : f32
    %159 = vector.broadcast %cst_25 : f32 to vector<2x96xf32>
    %160 = arith.addf %159, %158 : vector<2x96xf32>
    %161 = arith.divf %159, %160 : vector<2x96xf32>
    %162 = vector.extract_strided_slice %155 {offsets = [0, 96], sizes = [2, 32], strides = [1, 1]} : vector<2x128xf32> to vector<2x32xf32>
    %163 = math.tanh %162 : vector<2x32xf32>
    %164 = vector.extract_strided_slice %161 {offsets = [0, 0], sizes = [2, 32], strides = [1, 1]} : vector<2x96xf32> to vector<2x32xf32>
    %165 = vector.extract_strided_slice %161 {offsets = [0, 32], sizes = [2, 32], strides = [1, 1]} : vector<2x96xf32> to vector<2x32xf32>
    %166 = vector.extract_strided_slice %161 {offsets = [0, 64], sizes = [2, 32], strides = [1, 1]} : vector<2x96xf32> to vector<2x32xf32>
    %167 = arith.mulf %165, %149 : vector<2x32xf32>
    %168 = arith.mulf %164, %163 : vector<2x32xf32>
    %169 = arith.addf %167, %168 : vector<2x32xf32>
    %170 = math.tanh %169 : vector<2x32xf32>
    %171 = arith.mulf %166, %170 : vector<2x32xf32>
    %172 = vector.extract_strided_slice %9 {offsets = [8, 0, 0], sizes = [1, 2, 128], strides = [1, 1, 1]} : vector<16x2x128xf32> to vector<1x2x128xf32>
    %173 = vector.shape_cast %172 : vector<1x2x128xf32> to vector<2x128xf32>
    %cst_26 = arith.constant dense<0.000000e+00> : vector<2x128xf32>
    %174 = tpu.matmul %171, %3, %cst_26 {dimension_numbers = #tpu.dot_dimension_numbers<[1], [0], [0], [1], [0, 0, 1, 1], [], []>} : vector<2x32xf32>, vector<32x128xf32>, vector<2x128xf32> -> vector<2x128xf32>
    %175 = arith.addf %173, %174 : vector<2x128xf32>
    %176 = vector.extract_strided_slice %175 {offsets = [0, 0], sizes = [2, 96], strides = [1, 1]} : vector<2x128xf32> to vector<2x96xf32>
    %177 = arith.negf %176 : vector<2x96xf32>
    %178 = math.exp %177 : vector<2x96xf32>
    %cst_27 = arith.constant 1.000000e+00 : f32
    %179 = vector.broadcast %cst_27 : f32 to vector<2x96xf32>
    %180 = arith.addf %179, %178 : vector<2x96xf32>
    %181 = arith.divf %179, %180 : vector<2x96xf32>
    %182 = vector.extract_strided_slice %175 {offsets = [0, 96], sizes = [2, 32], strides = [1, 1]} : vector<2x128xf32> to vector<2x32xf32>
    %183 = math.tanh %182 : vector<2x32xf32>
    %184 = vector.extract_strided_slice %181 {offsets = [0, 0], sizes = [2, 32], strides = [1, 1]} : vector<2x96xf32> to vector<2x32xf32>
    %185 = vector.extract_strided_slice %181 {offsets = [0, 32], sizes = [2, 32], strides = [1, 1]} : vector<2x96xf32> to vector<2x32xf32>
    %186 = vector.extract_strided_slice %181 {offsets = [0, 64], sizes = [2, 32], strides = [1, 1]} : vector<2x96xf32> to vector<2x32xf32>
    %187 = arith.mulf %185, %169 : vector<2x32xf32>
    %188 = arith.mulf %184, %183 : vector<2x32xf32>
    %189 = arith.addf %187, %188 : vector<2x32xf32>
    %190 = math.tanh %189 : vector<2x32xf32>
    %191 = arith.mulf %186, %190 : vector<2x32xf32>
    %192 = vector.extract_strided_slice %9 {offsets = [9, 0, 0], sizes = [1, 2, 128], strides = [1, 1, 1]} : vector<16x2x128xf32> to vector<1x2x128xf32>
    %193 = vector.shape_cast %192 : vector<1x2x128xf32> to vector<2x128xf32>
    %cst_28 = arith.constant dense<0.000000e+00> : vector<2x128xf32>
    %194 = tpu.matmul %191, %3, %cst_28 {dimension_numbers = #tpu.dot_dimension_numbers<[1], [0], [0], [1], [0, 0, 1, 1], [], []>} : vector<2x32xf32>, vector<32x128xf32>, vector<2x128xf32> -> vector<2x128xf32>
    %195 = arith.addf %193, %194 : vector<2x128xf32>
    %196 = vector.extract_strided_slice %195 {offsets = [0, 0], sizes = [2, 96], strides = [1, 1]} : vector<2x128xf32> to vector<2x96xf32>
    %197 = arith.negf %196 : vector<2x96xf32>
    %198 = math.exp %197 : vector<2x96xf32>
    %cst_29 = arith.constant 1.000000e+00 : f32
    %199 = vector.broadcast %cst_29 : f32 to vector<2x96xf32>
    %200 = arith.addf %199, %198 : vector<2x96xf32>
    %201 = arith.divf %199, %200 : vector<2x96xf32>
    %202 = vector.extract_strided_slice %195 {offsets = [0, 96], sizes = [2, 32], strides = [1, 1]} : vector<2x128xf32> to vector<2x32xf32>
    %203 = math.tanh %202 : vector<2x32xf32>
    %204 = vector.extract_strided_slice %201 {offsets = [0, 0], sizes = [2, 32], strides = [1, 1]} : vector<2x96xf32> to vector<2x32xf32>
    %205 = vector.extract_strided_slice %201 {offsets = [0, 32], sizes = [2, 32], strides = [1, 1]} : vector<2x96xf32> to vector<2x32xf32>
    %206 = vector.extract_strided_slice %201 {offsets = [0, 64], sizes = [2, 32], strides = [1, 1]} : vector<2x96xf32> to vector<2x32xf32>
    %207 = arith.mulf %205, %189 : vector<2x32xf32>
    %208 = arith.mulf %204, %203 : vector<2x32xf32>
    %209 = arith.addf %207, %208 : vector<2x32xf32>
    %210 = math.tanh %209 : vector<2x32xf32>
    %211 = arith.mulf %206, %210 : vector<2x32xf32>
    %212 = vector.extract_strided_slice %9 {offsets = [10, 0, 0], sizes = [1, 2, 128], strides = [1, 1, 1]} : vector<16x2x128xf32> to vector<1x2x128xf32>
    %213 = vector.shape_cast %212 : vector<1x2x128xf32> to vector<2x128xf32>
    %cst_30 = arith.constant dense<0.000000e+00> : vector<2x128xf32>
    %214 = tpu.matmul %211, %3, %cst_30 {dimension_numbers = #tpu.dot_dimension_numbers<[1], [0], [0], [1], [0, 0, 1, 1], [], []>} : vector<2x32xf32>, vector<32x128xf32>, vector<2x128xf32> -> vector<2x128xf32>
    %215 = arith.addf %213, %214 : vector<2x128xf32>
    %216 = vector.extract_strided_slice %215 {offsets = [0, 0], sizes = [2, 96], strides = [1, 1]} : vector<2x128xf32> to vector<2x96xf32>
    %217 = arith.negf %216 : vector<2x96xf32>
    %218 = math.exp %217 : vector<2x96xf32>
    %cst_31 = arith.constant 1.000000e+00 : f32
    %219 = vector.broadcast %cst_31 : f32 to vector<2x96xf32>
    %220 = arith.addf %219, %218 : vector<2x96xf32>
    %221 = arith.divf %219, %220 : vector<2x96xf32>
    %222 = vector.extract_strided_slice %215 {offsets = [0, 96], sizes = [2, 32], strides = [1, 1]} : vector<2x128xf32> to vector<2x32xf32>
    %223 = math.tanh %222 : vector<2x32xf32>
    %224 = vector.extract_strided_slice %221 {offsets = [0, 0], sizes = [2, 32], strides = [1, 1]} : vector<2x96xf32> to vector<2x32xf32>
    %225 = vector.extract_strided_slice %221 {offsets = [0, 32], sizes = [2, 32], strides = [1, 1]} : vector<2x96xf32> to vector<2x32xf32>
    %226 = vector.extract_strided_slice %221 {offsets = [0, 64], sizes = [2, 32], strides = [1, 1]} : vector<2x96xf32> to vector<2x32xf32>
    %227 = arith.mulf %225, %209 : vector<2x32xf32>
    %228 = arith.mulf %224, %223 : vector<2x32xf32>
    %229 = arith.addf %227, %228 : vector<2x32xf32>
    %230 = math.tanh %229 : vector<2x32xf32>
    %231 = arith.mulf %226, %230 : vector<2x32xf32>
    %232 = vector.extract_strided_slice %9 {offsets = [11, 0, 0], sizes = [1, 2, 128], strides = [1, 1, 1]} : vector<16x2x128xf32> to vector<1x2x128xf32>
    %233 = vector.shape_cast %232 : vector<1x2x128xf32> to vector<2x128xf32>
    %cst_32 = arith.constant dense<0.000000e+00> : vector<2x128xf32>
    %234 = tpu.matmul %231, %3, %cst_32 {dimension_numbers = #tpu.dot_dimension_numbers<[1], [0], [0], [1], [0, 0, 1, 1], [], []>} : vector<2x32xf32>, vector<32x128xf32>, vector<2x128xf32> -> vector<2x128xf32>
    %235 = arith.addf %233, %234 : vector<2x128xf32>
    %236 = vector.extract_strided_slice %235 {offsets = [0, 0], sizes = [2, 96], strides = [1, 1]} : vector<2x128xf32> to vector<2x96xf32>
    %237 = arith.negf %236 : vector<2x96xf32>
    %238 = math.exp %237 : vector<2x96xf32>
    %cst_33 = arith.constant 1.000000e+00 : f32
    %239 = vector.broadcast %cst_33 : f32 to vector<2x96xf32>
    %240 = arith.addf %239, %238 : vector<2x96xf32>
    %241 = arith.divf %239, %240 : vector<2x96xf32>
    %242 = vector.extract_strided_slice %235 {offsets = [0, 96], sizes = [2, 32], strides = [1, 1]} : vector<2x128xf32> to vector<2x32xf32>
    %243 = math.tanh %242 : vector<2x32xf32>
    %244 = vector.extract_strided_slice %241 {offsets = [0, 0], sizes = [2, 32], strides = [1, 1]} : vector<2x96xf32> to vector<2x32xf32>
    %245 = vector.extract_strided_slice %241 {offsets = [0, 32], sizes = [2, 32], strides = [1, 1]} : vector<2x96xf32> to vector<2x32xf32>
    %246 = vector.extract_strided_slice %241 {offsets = [0, 64], sizes = [2, 32], strides = [1, 1]} : vector<2x96xf32> to vector<2x32xf32>
    %247 = arith.mulf %245, %229 : vector<2x32xf32>
    %248 = arith.mulf %244, %243 : vector<2x32xf32>
    %249 = arith.addf %247, %248 : vector<2x32xf32>
    %250 = math.tanh %249 : vector<2x32xf32>
    %251 = arith.mulf %246, %250 : vector<2x32xf32>
    %252 = vector.extract_strided_slice %9 {offsets = [12, 0, 0], sizes = [1, 2, 128], strides = [1, 1, 1]} : vector<16x2x128xf32> to vector<1x2x128xf32>
    %253 = vector.shape_cast %252 : vector<1x2x128xf32> to vector<2x128xf32>
    %cst_34 = arith.constant dense<0.000000e+00> : vector<2x128xf32>
    %254 = tpu.matmul %251, %3, %cst_34 {dimension_numbers = #tpu.dot_dimension_numbers<[1], [0], [0], [1], [0, 0, 1, 1], [], []>} : vector<2x32xf32>, vector<32x128xf32>, vector<2x128xf32> -> vector<2x128xf32>
    %255 = arith.addf %253, %254 : vector<2x128xf32>
    %256 = vector.extract_strided_slice %255 {offsets = [0, 0], sizes = [2, 96], strides = [1, 1]} : vector<2x128xf32> to vector<2x96xf32>
    %257 = arith.negf %256 : vector<2x96xf32>
    %258 = math.exp %257 : vector<2x96xf32>
    %cst_35 = arith.constant 1.000000e+00 : f32
    %259 = vector.broadcast %cst_35 : f32 to vector<2x96xf32>
    %260 = arith.addf %259, %258 : vector<2x96xf32>
    %261 = arith.divf %259, %260 : vector<2x96xf32>
    %262 = vector.extract_strided_slice %255 {offsets = [0, 96], sizes = [2, 32], strides = [1, 1]} : vector<2x128xf32> to vector<2x32xf32>
    %263 = math.tanh %262 : vector<2x32xf32>
    %264 = vector.extract_strided_slice %261 {offsets = [0, 0], sizes = [2, 32], strides = [1, 1]} : vector<2x96xf32> to vector<2x32xf32>
    %265 = vector.extract_strided_slice %261 {offsets = [0, 32], sizes = [2, 32], strides = [1, 1]} : vector<2x96xf32> to vector<2x32xf32>
    %266 = vector.extract_strided_slice %261 {offsets = [0, 64], sizes = [2, 32], strides = [1, 1]} : vector<2x96xf32> to vector<2x32xf32>
    %267 = arith.mulf %265, %249 : vector<2x32xf32>
    %268 = arith.mulf %264, %263 : vector<2x32xf32>
    %269 = arith.addf %267, %268 : vector<2x32xf32>
    %270 = math.tanh %269 : vector<2x32xf32>
    %271 = arith.mulf %266, %270 : vector<2x32xf32>
    %272 = vector.extract_strided_slice %9 {offsets = [13, 0, 0], sizes = [1, 2, 128], strides = [1, 1, 1]} : vector<16x2x128xf32> to vector<1x2x128xf32>
    %273 = vector.shape_cast %272 : vector<1x2x128xf32> to vector<2x128xf32>
    %cst_36 = arith.constant dense<0.000000e+00> : vector<2x128xf32>
    %274 = tpu.matmul %271, %3, %cst_36 {dimension_numbers = #tpu.dot_dimension_numbers<[1], [0], [0], [1], [0, 0, 1, 1], [], []>} : vector<2x32xf32>, vector<32x128xf32>, vector<2x128xf32> -> vector<2x128xf32>
    %275 = arith.addf %273, %274 : vector<2x128xf32>
    %276 = vector.extract_strided_slice %275 {offsets = [0, 0], sizes = [2, 96], strides = [1, 1]} : vector<2x128xf32> to vector<2x96xf32>
    %277 = arith.negf %276 : vector<2x96xf32>
    %278 = math.exp %277 : vector<2x96xf32>
    %cst_37 = arith.constant 1.000000e+00 : f32
    %279 = vector.broadcast %cst_37 : f32 to vector<2x96xf32>
    %280 = arith.addf %279, %278 : vector<2x96xf32>
    %281 = arith.divf %279, %280 : vector<2x96xf32>
    %282 = vector.extract_strided_slice %275 {offsets = [0, 96], sizes = [2, 32], strides = [1, 1]} : vector<2x128xf32> to vector<2x32xf32>
    %283 = math.tanh %282 : vector<2x32xf32>
    %284 = vector.extract_strided_slice %281 {offsets = [0, 0], sizes = [2, 32], strides = [1, 1]} : vector<2x96xf32> to vector<2x32xf32>
    %285 = vector.extract_strided_slice %281 {offsets = [0, 32], sizes = [2, 32], strides = [1, 1]} : vector<2x96xf32> to vector<2x32xf32>
    %286 = vector.extract_strided_slice %281 {offsets = [0, 64], sizes = [2, 32], strides = [1, 1]} : vector<2x96xf32> to vector<2x32xf32>
    %287 = arith.mulf %285, %269 : vector<2x32xf32>
    %288 = arith.mulf %284, %283 : vector<2x32xf32>
    %289 = arith.addf %287, %288 : vector<2x32xf32>
    %290 = math.tanh %289 : vector<2x32xf32>
    %291 = arith.mulf %286, %290 : vector<2x32xf32>
    %292 = vector.extract_strided_slice %9 {offsets = [14, 0, 0], sizes = [1, 2, 128], strides = [1, 1, 1]} : vector<16x2x128xf32> to vector<1x2x128xf32>
    %293 = vector.shape_cast %292 : vector<1x2x128xf32> to vector<2x128xf32>
    %cst_38 = arith.constant dense<0.000000e+00> : vector<2x128xf32>
    %294 = tpu.matmul %291, %3, %cst_38 {dimension_numbers = #tpu.dot_dimension_numbers<[1], [0], [0], [1], [0, 0, 1, 1], [], []>} : vector<2x32xf32>, vector<32x128xf32>, vector<2x128xf32> -> vector<2x128xf32>
    %295 = arith.addf %293, %294 : vector<2x128xf32>
    %296 = vector.extract_strided_slice %295 {offsets = [0, 0], sizes = [2, 96], strides = [1, 1]} : vector<2x128xf32> to vector<2x96xf32>
    %297 = arith.negf %296 : vector<2x96xf32>
    %298 = math.exp %297 : vector<2x96xf32>
    %cst_39 = arith.constant 1.000000e+00 : f32
    %299 = vector.broadcast %cst_39 : f32 to vector<2x96xf32>
    %300 = arith.addf %299, %298 : vector<2x96xf32>
    %301 = arith.divf %299, %300 : vector<2x96xf32>
    %302 = vector.extract_strided_slice %295 {offsets = [0, 96], sizes = [2, 32], strides = [1, 1]} : vector<2x128xf32> to vector<2x32xf32>
    %303 = math.tanh %302 : vector<2x32xf32>
    %304 = vector.extract_strided_slice %301 {offsets = [0, 0], sizes = [2, 32], strides = [1, 1]} : vector<2x96xf32> to vector<2x32xf32>
    %305 = vector.extract_strided_slice %301 {offsets = [0, 32], sizes = [2, 32], strides = [1, 1]} : vector<2x96xf32> to vector<2x32xf32>
    %306 = vector.extract_strided_slice %301 {offsets = [0, 64], sizes = [2, 32], strides = [1, 1]} : vector<2x96xf32> to vector<2x32xf32>
    %307 = arith.mulf %305, %289 : vector<2x32xf32>
    %308 = arith.mulf %304, %303 : vector<2x32xf32>
    %309 = arith.addf %307, %308 : vector<2x32xf32>
    %310 = math.tanh %309 : vector<2x32xf32>
    %311 = arith.mulf %306, %310 : vector<2x32xf32>
    %312 = vector.extract_strided_slice %9 {offsets = [15, 0, 0], sizes = [1, 2, 128], strides = [1, 1, 1]} : vector<16x2x128xf32> to vector<1x2x128xf32>
    %313 = vector.shape_cast %312 : vector<1x2x128xf32> to vector<2x128xf32>
    %cst_40 = arith.constant dense<0.000000e+00> : vector<2x128xf32>
    %314 = tpu.matmul %311, %3, %cst_40 {dimension_numbers = #tpu.dot_dimension_numbers<[1], [0], [0], [1], [0, 0, 1, 1], [], []>} : vector<2x32xf32>, vector<32x128xf32>, vector<2x128xf32> -> vector<2x128xf32>
    %315 = arith.addf %313, %314 : vector<2x128xf32>
    %316 = vector.extract_strided_slice %315 {offsets = [0, 0], sizes = [2, 96], strides = [1, 1]} : vector<2x128xf32> to vector<2x96xf32>
    %317 = arith.negf %316 : vector<2x96xf32>
    %318 = math.exp %317 : vector<2x96xf32>
    %cst_41 = arith.constant 1.000000e+00 : f32
    %319 = vector.broadcast %cst_41 : f32 to vector<2x96xf32>
    %320 = arith.addf %319, %318 : vector<2x96xf32>
    %321 = arith.divf %319, %320 : vector<2x96xf32>
    %322 = vector.extract_strided_slice %315 {offsets = [0, 96], sizes = [2, 32], strides = [1, 1]} : vector<2x128xf32> to vector<2x32xf32>
    %323 = math.tanh %322 : vector<2x32xf32>
    %324 = vector.extract_strided_slice %321 {offsets = [0, 0], sizes = [2, 32], strides = [1, 1]} : vector<2x96xf32> to vector<2x32xf32>
    %325 = vector.extract_strided_slice %321 {offsets = [0, 32], sizes = [2, 32], strides = [1, 1]} : vector<2x96xf32> to vector<2x32xf32>
    %326 = vector.extract_strided_slice %321 {offsets = [0, 64], sizes = [2, 32], strides = [1, 1]} : vector<2x96xf32> to vector<2x32xf32>
    %327 = arith.mulf %325, %309 : vector<2x32xf32>
    %328 = arith.mulf %324, %323 : vector<2x32xf32>
    %329 = arith.addf %327, %328 : vector<2x32xf32>
    %330 = math.tanh %329 : vector<2x32xf32>
    %331 = arith.mulf %326, %330 : vector<2x32xf32>
    %332 = vector.shape_cast %31 : vector<2x32xf32> to vector<2x1x32xf32>
    %333 = vector.shape_cast %51 : vector<2x32xf32> to vector<2x1x32xf32>
    %334 = vector.shape_cast %71 : vector<2x32xf32> to vector<2x1x32xf32>
    %335 = vector.shape_cast %91 : vector<2x32xf32> to vector<2x1x32xf32>
    %336 = vector.shape_cast %111 : vector<2x32xf32> to vector<2x1x32xf32>
    %337 = vector.shape_cast %131 : vector<2x32xf32> to vector<2x1x32xf32>
    %338 = vector.shape_cast %151 : vector<2x32xf32> to vector<2x1x32xf32>
    %339 = vector.shape_cast %171 : vector<2x32xf32> to vector<2x1x32xf32>
    %340 = vector.shape_cast %191 : vector<2x32xf32> to vector<2x1x32xf32>
    %341 = vector.shape_cast %211 : vector<2x32xf32> to vector<2x1x32xf32>
    %342 = vector.shape_cast %231 : vector<2x32xf32> to vector<2x1x32xf32>
    %343 = vector.shape_cast %251 : vector<2x32xf32> to vector<2x1x32xf32>
    %344 = vector.shape_cast %271 : vector<2x32xf32> to vector<2x1x32xf32>
    %345 = vector.shape_cast %291 : vector<2x32xf32> to vector<2x1x32xf32>
    %346 = vector.shape_cast %311 : vector<2x32xf32> to vector<2x1x32xf32>
    %347 = vector.shape_cast %331 : vector<2x32xf32> to vector<2x1x32xf32>
    %348 = tpu.concatenate %332, %333, %334, %335, %336, %337, %338, %339, %340, %341, %342, %343, %344, %345, %346, %347 in 1 : vector<2x1x32xf32>, vector<2x1x32xf32>, vector<2x1x32xf32>, vector<2x1x32xf32>, vector<2x1x32xf32>, vector<2x1x32xf32>, vector<2x1x32xf32>, vector<2x1x32xf32>, vector<2x1x32xf32>, vector<2x1x32xf32>, vector<2x1x32xf32>, vector<2x1x32xf32>, vector<2x1x32xf32>, vector<2x1x32xf32>, vector<2x1x32xf32>, vector<2x1x32xf32> -> vector<2x16x32xf32>
    %349 = vector.shape_cast %331 : vector<2x32xf32> to vector<2x1x32xf32>
    %350 = vector.shape_cast %311 : vector<2x32xf32> to vector<2x1x32xf32>
    %351 = vector.shape_cast %291 : vector<2x32xf32> to vector<2x1x32xf32>
    %352 = vector.shape_cast %271 : vector<2x32xf32> to vector<2x1x32xf32>
    %353 = vector.shape_cast %251 : vector<2x32xf32> to vector<2x1x32xf32>
    %354 = vector.shape_cast %231 : vector<2x32xf32> to vector<2x1x32xf32>
    %355 = vector.shape_cast %211 : vector<2x32xf32> to vector<2x1x32xf32>
    %356 = vector.shape_cast %191 : vector<2x32xf32> to vector<2x1x32xf32>
    %357 = vector.shape_cast %171 : vector<2x32xf32> to vector<2x1x32xf32>
    %358 = vector.shape_cast %151 : vector<2x32xf32> to vector<2x1x32xf32>
    %359 = vector.shape_cast %131 : vector<2x32xf32> to vector<2x1x32xf32>
    %360 = vector.shape_cast %111 : vector<2x32xf32> to vector<2x1x32xf32>
    %361 = vector.shape_cast %91 : vector<2x32xf32> to vector<2x1x32xf32>
    %362 = vector.shape_cast %71 : vector<2x32xf32> to vector<2x1x32xf32>
    %363 = vector.shape_cast %51 : vector<2x32xf32> to vector<2x1x32xf32>
    %364 = vector.shape_cast %31 : vector<2x32xf32> to vector<2x1x32xf32>
    %365 = tpu.concatenate %349, %350, %351, %352, %353, %354, %355, %356, %357, %358, %359, %360, %361, %362, %363, %364 in 1 : vector<2x1x32xf32>, vector<2x1x32xf32>, vector<2x1x32xf32>, vector<2x1x32xf32>, vector<2x1x32xf32>, vector<2x1x32xf32>, vector<2x1x32xf32>, vector<2x1x32xf32>, vector<2x1x32xf32>, vector<2x1x32xf32>, vector<2x1x32xf32>, vector<2x1x32xf32>, vector<2x1x32xf32>, vector<2x1x32xf32>, vector<2x1x32xf32>, vector<2x1x32xf32> -> vector<2x16x32xf32>
    %366 = vector.extract_strided_slice %348 {offsets = [0, 0, 0], sizes = [2, 16, 16], strides = [1, 1, 1]} : vector<2x16x32xf32> to vector<2x16x16xf32>
    %367 = vector.extract_strided_slice %365 {offsets = [0, 0, 16], sizes = [2, 16, 16], strides = [1, 1, 1]} : vector<2x16x32xf32> to vector<2x16x16xf32>
    %368 = tpu.concatenate %366, %367 in 2 : vector<2x16x16xf32>, vector<2x16x16xf32> -> vector<2x16x32xf32>
    "tpu.trace_start"() <{level = 10 : i32, message = "bte,ef->btf"}> : () -> ()
    %cst_42 = arith.constant dense<0.000000e+00> : vector<2x16x96xf32>
    %369 = tpu.matmul %368, %4, %cst_42 {dimension_numbers = #tpu.dot_dimension_numbers<[2], [0], [0, 1], [1], [0, 0, 0, 1, 1, 1], [], []>} : vector<2x16x32xf32>, vector<32x96xf32>, vector<2x16x96xf32> -> vector<2x16x96xf32>
    "tpu.trace_stop"() : () -> ()
    %370 = vector.extract_strided_slice %369 {offsets = [0, 0, 0], sizes = [2, 16, 32], strides = [1, 1, 1]} : vector<2x16x96xf32> to vector<2x16x32xf32>
    %371 = vector.extract_strided_slice %369 {offsets = [0, 0, 32], sizes = [2, 16, 32], strides = [1, 1, 1]} : vector<2x16x96xf32> to vector<2x16x32xf32>
    %372 = vector.extract_strided_slice %369 {offsets = [0, 0, 64], sizes = [2, 16, 32], strides = [1, 1, 1]} : vector<2x16x96xf32> to vector<2x16x32xf32>
    %373 = vector.extract_strided_slice %370 {offsets = [0, 0, 0], sizes = [2, 16, 8], strides = [1, 1, 1]} : vector<2x16x32xf32> to vector<2x16x8xf32>
    %374 = vector.extract_strided_slice %370 {offsets = [0, 0, 8], sizes = [2, 16, 8], strides = [1, 1, 1]} : vector<2x16x32xf32> to vector<2x16x8xf32>
    %375 = vector.extract_strided_slice %370 {offsets = [0, 0, 16], sizes = [2, 16, 8], strides = [1, 1, 1]} : vector<2x16x32xf32> to vector<2x16x8xf32>
    %376 = vector.extract_strided_slice %370 {offsets = [0, 0, 24], sizes = [2, 16, 8], strides = [1, 1, 1]} : vector<2x16x32xf32> to vector<2x16x8xf32>
    %377 = tpu.concatenate %373, %374, %375, %376 in 0 : vector<2x16x8xf32>, vector<2x16x8xf32>, vector<2x16x8xf32>, vector<2x16x8xf32> -> vector<8x16x8xf32>
    %378 = vector.extract_strided_slice %371 {offsets = [0, 0, 0], sizes = [2, 16, 8], strides = [1, 1, 1]} : vector<2x16x32xf32> to vector<2x16x8xf32>
    %379 = vector.extract_strided_slice %371 {offsets = [0, 0, 8], sizes = [2, 16, 8], strides = [1, 1, 1]} : vector<2x16x32xf32> to vector<2x16x8xf32>
    %380 = vector.extract_strided_slice %371 {offsets = [0, 0, 16], sizes = [2, 16, 8], strides = [1, 1, 1]} : vector<2x16x32xf32> to vector<2x16x8xf32>
    %381 = vector.extract_strided_slice %371 {offsets = [0, 0, 24], sizes = [2, 16, 8], strides = [1, 1, 1]} : vector<2x16x32xf32> to vector<2x16x8xf32>
    %382 = tpu.concatenate %378, %379, %380, %381 in 0 : vector<2x16x8xf32>, vector<2x16x8xf32>, vector<2x16x8xf32>, vector<2x16x8xf32> -> vector<8x16x8xf32>
    %383 = vector.extract_strided_slice %372 {offsets = [0, 0, 0], sizes = [2, 16, 8], strides = [1, 1, 1]} : vector<2x16x32xf32> to vector<2x16x8xf32>
    %384 = vector.extract_strided_slice %372 {offsets = [0, 0, 8], sizes = [2, 16, 8], strides = [1, 1, 1]} : vector<2x16x32xf32> to vector<2x16x8xf32>
    %385 = vector.extract_strided_slice %372 {offsets = [0, 0, 16], sizes = [2, 16, 8], strides = [1, 1, 1]} : vector<2x16x32xf32> to vector<2x16x8xf32>
    %386 = vector.extract_strided_slice %372 {offsets = [0, 0, 24], sizes = [2, 16, 8], strides = [1, 1, 1]} : vector<2x16x32xf32> to vector<2x16x8xf32>
    %387 = tpu.concatenate %383, %384, %385, %386 in 0 : vector<2x16x8xf32>, vector<2x16x8xf32>, vector<2x16x8xf32>, vector<2x16x8xf32> -> vector<8x16x8xf32>
    "tpu.trace_start"() <{level = 10 : i32, message = "nqd,nkd->nqk"}> : () -> ()
    %cst_43 = arith.constant dense<0.000000e+00> : vector<8x16x16xf32>
    %388 = tpu.matmul %377, %382, %cst_43 {dimension_numbers = #tpu.dot_dimension_numbers<[2], [2], [1], [1], [0, 0, 0, 1, 1, 1], [0], [0]>} : vector<8x16x8xf32>, vector<8x16x8xf32>, vector<8x16x16xf32> -> vector<8x16x16xf32>
    "tpu.trace_stop"() : () -> ()
    %cst_44 = arith.constant 0.353553385 : f32
    %389 = vector.broadcast %cst_44 : f32 to vector<8x16x16xf32>
    %390 = arith.mulf %388, %389 : vector<8x16x16xf32>
    %cst_45 = arith.constant dense<0xFF800000> : vector<16x16xf32>
    %391 = vector.multi_reduction <maximumf>, %390, %cst_45 [0] : vector<8x16x16xf32> to vector<16x16xf32>
    %392 = vector.shape_cast %391 : vector<16x16xf32> to vector<1x16x16xf32>
    %393 = vector.broadcast %392 : vector<1x16x16xf32> to vector<8x16x16xf32>
    %394 = arith.subf %390, %393 : vector<8x16x16xf32>
    %395 = math.exp %394 : vector<8x16x16xf32>
    %cst_46 = arith.constant dense<0.000000e+00> : vector<16x16xf32>
    %396 = vector.multi_reduction <add>, %395, %cst_46 [0] : vector<8x16x16xf32> to vector<16x16xf32>
    %397 = vector.shape_cast %396 : vector<16x16xf32> to vector<1x16x16xf32>
    %398 = tpu.reciprocal %397 {approx = true} : vector<1x16x16xf32> -> vector<1x16x16xf32>
    %399 = vector.broadcast %398 : vector<1x16x16xf32> to vector<8x16x16xf32>
    %400 = arith.mulf %395, %399 : vector<8x16x16xf32>
    "tpu.trace_start"() <{level = 10 : i32, message = "nqk,nkd->nqd"}> : () -> ()
    %cst_47 = arith.constant dense<0.000000e+00> : vector<8x16x8xf32>
    %401 = tpu.matmul %400, %387, %cst_47 {dimension_numbers = #tpu.dot_dimension_numbers<[2], [1], [1], [2], [0, 0, 0, 1, 1, 2], [0], [0]>} : vector<8x16x16xf32>, vector<8x16x8xf32>, vector<8x16x8xf32> -> vector<8x16x8xf32>
    "tpu.trace_stop"() : () -> ()
    %402 = vector.extract_strided_slice %401 {offsets = [0, 0, 0], sizes = [2, 16, 8], strides = [1, 1, 1]} : vector<8x16x8xf32> to vector<2x16x8xf32>
    %403 = vector.extract_strided_slice %401 {offsets = [2, 0, 0], sizes = [2, 16, 8], strides = [1, 1, 1]} : vector<8x16x8xf32> to vector<2x16x8xf32>
    %404 = vector.extract_strided_slice %401 {offsets = [4, 0, 0], sizes = [2, 16, 8], strides = [1, 1, 1]} : vector<8x16x8xf32> to vector<2x16x8xf32>
    %405 = vector.extract_strided_slice %401 {offsets = [6, 0, 0], sizes = [2, 16, 8], strides = [1, 1, 1]} : vector<8x16x8xf32> to vector<2x16x8xf32>
    %406 = tpu.concatenate %402, %403, %404, %405 in 2 : vector<2x16x8xf32>, vector<2x16x8xf32>, vector<2x16x8xf32>, vector<2x16x8xf32> -> vector<2x16x32xf32>
    "tpu.trace_start"() <{level = 10 : i32, message = "bte,ef->btf"}> : () -> ()
    %cst_48 = arith.constant dense<0.000000e+00> : vector<2x16x32xf32>
    %407 = tpu.matmul %406, %5, %cst_48 {dimension_numbers = #tpu.dot_dimension_numbers<[2], [0], [0, 1], [1], [0, 0, 0, 1, 1, 1], [], []>} : vector<2x16x32xf32>, vector<32x32xf32>, vector<2x16x32xf32> -> vector<2x16x32xf32>
    "tpu.trace_stop"() : () -> ()
    %c0_49 = arith.constant 0 : index
    %c0_50 = arith.constant 0 : index
    %c0_51 = arith.constant 0 : index
    %408 = vector.load %arg2[%c0_49, %c0_50, %c0_51] : memref<2x16x32xf32, #tpu.memory_space<vmem>>, vector<2x16x32xf32>
    tpu.vector_store %arg2[%c0_49, %c0_50, %c0_51], %407 {strides = array<i32>} : memref<2x16x32xf32, #tpu.memory_space<vmem>>, vector<2x16x32xf32>,
    return
  }
}

</mosaic_0001>

<bundles_post_ra>
// kernel: attention_bottleneck_lstm.1
= control target key start
LH: loop header
LB: loop body
LE: loop exit
PB: predicated region body
PF: predicated region fallthrough
CT: control target
= control target key end

     0   :  { %v74_v3 = vlaneseq  ;;  %v5363_v6 = vmov 0.0|0.0   ;;  %v5364_v7 = vmov 1983009808   ;;  %vm5365_vm0 = vmmov 0   ;;  %s6253_s0 = inlined_call_operand.vmem [shape: f32[16,2,64], index: 0, kind: input, shape index: {}]   ;;  %s6254_s1 = inlined_call_operand.vmem [shape: f32[168,128], index: 1, kind: input, shape index: {}]   ;;  %s6255_s2 = inlined_call_operand.hbm [shape: f32[2,16,32], index: 2, kind: output, shape index: {}]  }
   0x1   :  { %v28_v0 = vld [vmem:[%s6254_s1] sm:$0xff]  ;;  %v29_v1 = vld [vmem:[%s6254_s1 + $0x8] sm:$0xff]  ;;  %v30_v2 = vld [vmem:[%s6254_s1 + $0x10] sm:$0xff]  ;;  %4887 = vmatprep.subr.bf16.mxu1 %v5363_v6  ;;  %v72_v8 = vunpack.c.l.s4 %v5364_v7  ;;  %v5366_v18 = vmov 0.0  }
   0x2   :  { %v4871_v4 = vpack.c.bf16 %v29_v1, %v28_v0  ;;  %v31_v5 = vld [vmem:[%s6254_s1 + $0x18] sm:$0xff]  ;;  %v32_v10 = vld [vmem:[%s6254_s1 + $0x20] sm:$0xff]  ;;  %v33_v11 = vld [vmem:[%s6254_s1 + $0x28] sm:$0xff]  ;;  %v5416_v13 = vshrl.u32 %v74_v3, 7  ;;  %4563 = vmatprep.mubr.msk.f32.mxu1 %vm5365_vm0, %v5366_v18 }
   0x3   :  { %v4875_v9 = vpack.c.bf16 %v31_v5, %v30_v2  ;;  %v37_v12 = vld [vmem:[%s6254_s1 + $0x48] sm:$0xff]  ;;  %v38_v14 = vld [vmem:[%s6254_s1 + $0x50] sm:$0xff]  ;;  %v12_v15 = vld [vmem:[%s6253_s0] sm:$0x3]  ;;  %v73_v17 = vunpack.c.0.s8 %v72_v8  ;;  %v4879_v25 = vpack.c.bf16 %v33_v11, %v32_v10 }
   0x4   :  { %4872 = vmatprep.subr.bf16.mxu0 %v4871_v4  ;;  %v13_v16 = vld [vmem:[%s6253_s0 + $0x2] sm:$0x3]  ;;  %v34_v19 = vld [vmem:[%s6254_s1 + $0x30] sm:$0xff]  ;;  %v5432_v20 = vpack.c.bf16 %v38_v14, %v37_v12  ;;  %v14_v21 = vld [vmem:[%s6253_s0 + $0x4] sm:$0x3] }
   0x5   :  { %4874 = vmatpush3.bf16.msra.mxu0 %v4871_v4  ;;  %v15_v22 = vld [vmem:[%s6253_s0 + $0x6] sm:$0x3]  ;;  %v69_v23 = vcombine.low %v12_v15, %v13_v16  ;;  %v16_v24 = vld [vmem:[%s6253_s0 + $0x8] sm:$0x3]  ;;  %v5444_v27 = vsub.s32 %v73_v17, %v5416_v13  ;;  %v17_v28 = vld [vmem:[%s6253_s0 + $0xa] sm:$0x3] }
   0x6   :  { %4876 = vmatprep.subr.bf16.mxu0 %v4875_v9  ;;  %v70_v26 = vcombine.low %v14_v21, %v15_v22  ;;  %v18_v29 = vld [vmem:[%s6253_s0 + $0xc] sm:$0x3]  ;;  %v19_v30 = vld [vmem:[%s6253_s0 + $0xe] sm:$0x3]  ;;  %v35_v31 = vld [vmem:[%s6254_s1 + $0x38] sm:$0xff]  ;;  %4889 = vmatpush3.bf16.msra.mxu1 %v5432_v20  ;;  %v86_v32 = vcombine.low %v16_v24, %v17_v28 }
   0x7   :  { %v39_v33 = vld [vmem:[%s6254_s1 + $0x58] sm:$0xff]  ;;  %v40_v34 = vld [vmem:[%s6254_s1 + $0x60] sm:$0xff]  ;;  %v77_v35 = vrot.slane %v69_v23, %v5444_v27  ;;  %v87_v37 = vcombine.low %v18_v29, %v19_v30  ;;  %4890 = vmatprep.subr.bf16.mxu1 %v5363_v6 }
   0x8   :  { %v84_v36 = vrot.slane %v70_v26, %v5444_v27  ;;  %v5468_v38 = vpack.c.bf16 %v40_v34, %v39_v33 }
   0x9   :  { %7 = vsyncpa [#allocation3], 0  ;;  %4878 = vmatpush3.bf16.msra.mxu0 %v4875_v9  ;;  %vm148_vm1 = vcmask 523264   ;;  %v4883_v39 = vpack.c.bf16 %v35_v31, %v34_v19  ;;  %v94_v41 = vrot.slane %v86_v32, %v5444_v27  ;;  %v101_v42 = vrot.slane %v87_v37, %v5444_v27  ;;  %v4269_v44 = vld [vmem:[%s6254_s1 + $0x40] ss:$0 sm:$0xff]  ;;  %s5367_s23 = smov 32  }
   0xa   :  { %4880 = vmatprep.subr.bf16.mxu0 %v4879_v25  ;;  %v85_v40 = vcombine.low %v77_v35, %v84_v36  ;;  %4892 = vmatpush3.bf16.msra.mxu1 %v5468_v38  ;;  %v138_v45 = vcombine.low %v4269_v44, %v4269_v44  ;;  %s5368_s24 = smov 64   ;;  %vm330_vm2 = vcmask 261120   ;;  %vm2311_vm3 = vcmask 1040384   ;;  %s5370_s20 = smov 120  }
   0xb   :  { %4893 = vmatprep.subr.bf16.mxu1 %v5363_v6  ;;  %v102_v43 = vcombine.low %v94_v41, %v101_v42  ;;  %vm2314_vm4 = vcmask 1041408   ;;  %vm2317_vm5 = vcmask 1042432   ;;  %vm2320_vm6 = vcmask 1043456   ;;  %s5371_s21 = smov 112   ;;  %s5372_s22 = smov 104  }
   0xc   :  { %4549 = vmatprep.mubr.msk.f32.mxu0 %vm148_vm1, %v85_v40  ;;  %v145_v46 = vrot.slane %v138_v45, %v5444_v27  ;;  %vm2323_vm7 = vcmask 1044480   ;;  %vm2326_vm8 = vcmask 1045504   ;;  %vm2329_vm9 = vcmask 1046528   ;;  %s5374_s4 = smov 8   ;;  %s5375_s5 = smov 16  }
   0xd   :  { %4882 = vmatpush3.bf16.msra.mxu0 %v4879_v25  ;;  %4564 = vmatmul.mubr.f32.vlgmr.msra.gmra.mrb[0].mxu1 %v5366_v18  ;;  %vm2426_vm10 = vcmask 130048   ;;  %vm2560_vm11 = vcmask 64512   ;;  %vm4147_vm13 = vcmask 195584   ;;  %s5377_s6 = smov [#allocation2]  }
   0xe   :  { %4884 = vmatprep.subr.bf16.mxu0 %v4883_v39  ;;  %4895 = vmatpush3.bf16.msra.mxu1 %v5432_v20  ;;  %v5492_v49 = vcombine.low %v145_v46, %v145_v46  ;;  %vm6040_vm12 = vmpackc.low %vm2560_vm11, %vm2560_vm11  ;;  %s4258_s7 = sshll.u32 %s5377_s6, 4  ;;  %s4259_s7 = int_to_ptr.vmem [resolvable:$true] %s4258_s7 }
   0xf   :  { %4574 = vmatprep.mubr.msk.f32.mxu1 %vm5365_vm0, %v5366_v18  ;;  %4896 = vmatprep.subr.bf16.mxu1 %v5363_v6  ;;  %s5339_s8 = scalar_lea.vmem %s4259_s7, 512  ;;  %p5344_p1 = scmp.lt.s32.totalorder %s4259_s7, %s4259_s7 }
  0x10   :  { %p5340_p0 = scmp.ne.s32.totalorder %s4259_s7, %s5339_s8  ;;  %p5345_p2 = scmp.lt.s32.totalorder %s5339_s8, %s5339_s8 }
  0x11   :  { %4886 = vmatpush3.bf16.msra.mxu0 %v4883_v39 }
  0x12   :  { %4911 = vmatprep.subr.bf16.mxu0 %v5363_v6  ;;  %4898 = vmatpush3.bf16.msra.mxu1 %v5468_v38  ;;  %p5346_p3 = por %p5345_p2, %p5344_p1 }
  0x13   :  { %4899 = vmatprep.subr.bf16.mxu1 %v5363_v6 }
  0x14   :  { %4550 = vmatmul.mubr.msk.f32.vlgmr.msra.gmra.mrb[0].mxu0 %vm148_vm1, %v102_v43  ;;  %p5347_p4 = pnand %p5346_p3, %p5340_p0 }
  0x15   :  { %4913 = vmatpush3.bf16.msra.mxu0 %v5432_v20 }
  0x16   :  { %4914 = vmatprep.subr.bf16.mxu0 %v5363_v6 }
  0x19   :  { %4916 = vmatpush3.bf16.msra.mxu0 %v5468_v38 }
  0x1a   :  { %4923 = vmatprep.subr.bf16.mxu0 %v5363_v6 }
  0xe0   :  { %v400_v47 = vpop.f32.mrb[0].mxu1 }
  0xe1   :  { %v4565_v48 = vpop.f32.mrb[1].mxu1 }
  0xe7   :  { %v5494_v50 = vpop.f32.mrb[0].mxu0 }
  0xe8   :  { %v223_v51 = vpop.f32.mrb[1].mxu0 }
  0xe9   :  { %v5497_v52 = vadd.f32 %v223_v51, %v5492_v49 }
  0xeb   :  { %v253_v53 = vrot.slane %v5497_v52, %v5444_v27  ;;  %v246_v30 = vcombine.high %v5497_v52, %v5497_v52 }
  0xed   :  { %v404_v54 = vadd.f32 %v400_v47, %v253_v53  ;;  %v261_v7 = vcombine.high %v253_v53, %v253_v53  ;;  %v260_v31 = vrot.slane %v246_v30, %v5444_v27 }
  0xef   :  { %5175 = vtanh.f32 %v404_v54  ;;  %v4274_v56 = vmul.f32 -1.442695, %v404_v54  ;;  %v262_v53 = vcombine.high %v260_v31, %v260_v31 }
  0xf1   :  { %5177 = vpow2.f32 %v4274_v56 }
  0xf9   :  { %v5176_v55 = vpop.eup %5175 }
  0xfa   :  { %414 = vrot.lane.b32.xlu0 %v5176_v55, %s5367_s23 }
  0xfb   :  { %v5178_v57 = vpop.eup %5177 }
  0xfc   :  { %v408_v58 = vadd.f32 1.0, %v5178_v57 }
  0xfe   :  { %5179 = vrcp.f32 %v408_v58 }
 0x108   :  { %v5180_v59 = vpop.eup %5179 }
 0x109   :  { %v412_v62 = vmul.f32 0.0, %v5180_v59 }
 0x16c   :  { %v415_v60 = vpop.permute.xlu0 %414 }
 0x16d   :  { %v417_v61 = vmul.f32 %v5180_v59, %v415_v60 }
 0x16f   :  { %419 = vrot.lane.b32.xlu0 %v417_v61, %s5367_s23 }
 0x1e1   :  { %v420_v63 = vpop.permute.xlu0 %419 }
 0x1e2   :  { %v422_v0 = vadd.f32 %v420_v63, %v412_v62 }
 0x1e4   :  { %5181 = vtanh.f32 %v422_v0 }
 0x1ee   :  { %v5182_v1 = vpop.eup %5181 }
 0x1ef   :  { %425 = vrot.lane.b32.xlu1 %v5182_v1, %s5367_s23 }
 0x261   :  { %v426_v2 = vpop.permute.xlu1 %425 }
 0x262   :  { %v5504_v3 = vmul.f32 %v5180_v59, %v426_v2 }
 0x264   :  { %v436_v4 = vrot.slane %v5504_v3, %v5444_v27 }
 0x266   :  { %437 = vrot.lane.b32.xlu1 %v436_v4, %s5368_s24  ;;  %v20_v4 = vld [vmem:[%s6253_s0 + $0x10] sm:$0x3] }
 0x2d8   :  { %v438_v5 = vpop.permute.xlu1 %437 }
 0x2d9   :  { %4575 = vmatmul.mubr.msk.f32.vlgmr.msra.gmra.mrb[2].mxu1 %vm330_vm2, %v438_v5  ;;  %v21_v5 = vld [vmem:[%s6253_s0 + $0x12] sm:$0x3] }
 0x2da   :  { %4901 = vmatpush3.bf16.msra.mxu1 %v5432_v20  ;;  %4585 = vmatprep.mubr.msk.f32.mxu1 %vm5365_vm0, %v5366_v18 }
 0x2db   :  { %4902 = vmatprep.subr.bf16.mxu1 %v5363_v6 }
 0x2de   :  { %4904 = vmatpush3.bf16.msra.mxu1 %v5468_v38 }
 0x2df   :  { %4905 = vmatprep.subr.bf16.mxu1 %v5363_v6 }
 0x3ac   :  { %v507_v8 = vpop.f32.mrb[2].mxu1 }
 0x3ad   :  { %v511_v9 = vadd.f32 %v507_v8, %v261_v7  ;;  %v4576_v10 = vpop.f32.mrb[3].mxu1  ;;  %v22_v7 = vld [vmem:[%s6253_s0 + $0x14] sm:$0x3]  ;;  %v23_v8 = vld [vmem:[%s6253_s0 + $0x16] sm:$0x3] }
 0x3ae   :  { %v24_v10 = vld [vmem:[%s6253_s0 + $0x18] sm:$0x3] }
 0x3af   :  { %5183 = vtanh.f32 %v511_v9  ;;  %v4276_v12 = vmul.f32 -1.442695, %v511_v9  ;;  %v103_v9 = vcombine.low %v20_v4, %v21_v5 }
 0x3b1   :  { %5185 = vpow2.f32 %v4276_v12  ;;  %v104_v12 = vcombine.low %v22_v7, %v23_v8 }
 0x3b9   :  { %v5184_v11 = vpop.eup %5183 }
 0x3ba   :  { %521 = vrot.lane.b32.xlu0 %v5184_v11, %s5367_s23  ;;  %v25_v11 = vld [vmem:[%s6253_s0 + $0x1a] sm:$0x3] }
 0x3bb   :  { %v5186_v14 = vpop.eup %5185 }
 0x3bc   :  { %v515_v15 = vadd.f32 1.0, %v5186_v14  ;;  %v26_v14 = vld [vmem:[%s6253_s0 + $0x1c] sm:$0x3] }
 0x3be   :  { %5187 = vrcp.f32 %v515_v15  ;;  %v27_v15 = vld [vmem:[%s6253_s0 + $0x1e] sm:$0x3] }
 0x3c8   :  { %v5188_v16 = vpop.eup %5187 }
 0x3c9   :  { %v519_v21 = vmul.f32 %v5188_v16, %v422_v0 }
 0x42c   :  { %v522_v17 = vpop.permute.xlu0 %521 }
 0x42d   :  { %v524_v19 = vmul.f32 %v5188_v16, %v522_v17  ;;  %v111_v17 = vrot.slane %v103_v9, %v5444_v27 }
 0x42f   :  { %526 = vrot.lane.b32.xlu1 %v524_v19, %s5367_s23  ;;  %v121_v19 = vcombine.low %v26_v14, %v27_v15 }
 0x4a1   :  { %v527_v22 = vpop.permute.xlu1 %526 }
 0x4a2   :  { %v529_v23 = vadd.f32 %v527_v22, %v519_v21  ;;  %v118_v21 = vrot.slane %v104_v12, %v5444_v27 }
 0x4a4   :  { %5189 = vtanh.f32 %v529_v23 }
 0x4ae   :  { %v5190_v24 = vpop.eup %5189 }
 0x4af   :  { %532 = vrot.lane.b32.xlu0 %v5190_v24, %s5367_s23 }
 0x521   :  { %v533_v25 = vpop.permute.xlu0 %532 }
 0x522   :  { %v5519_v26 = vmul.f32 %v5188_v16, %v533_v25  ;;  %v120_v16 = vcombine.low %v24_v10, %v25_v11  ;;  %v119_v25 = vcombine.low %v111_v17, %v118_v21 }
 0x524   :  { %v543_v28 = vrot.slane %v5519_v26, %v5444_v27  ;;  %v128_v22 = vrot.slane %v120_v16, %v5444_v27  ;;  %4552 = vmatprep.mubr.msk.f32.mxu0 %vm148_vm1, %v119_v25 }
 0x526   :  { %544 = vrot.lane.b32.xlu1 %v543_v28, %s5368_s24 }
 0x598   :  { %v545_v29 = vpop.permute.xlu1 %544 }
 0x599   :  { %4586 = vmatmul.mubr.msk.f32.vlgmr.msra.gmra.mrb[4].mxu1 %vm330_vm2, %v545_v29 }
 0x59a   :  { %4907 = vmatpush3.bf16.msra.mxu1 %v5432_v20  ;;  %4596 = vmatprep.mubr.msk.f32.mxu1 %vm5365_vm0, %v5366_v18 }
 0x59b   :  { %4908 = vmatprep.subr.bf16.mxu1 %v5363_v6 }
 0x59e   :  { %4910 = vmatpush3.bf16.msra.mxu1 %v5468_v38 }
 0x59f   :  { %4917 = vmatprep.subr.bf16.mxu1 %v5363_v6 }
 0x66c   :  { %v614_v32 = vpop.f32.mrb[4].mxu1 }
 0x66d   :  { %v618_v33 = vadd.f32 %v614_v32, %v260_v31  ;;  %v4587_v34 = vpop.f32.mrb[5].mxu1 }
 0x66f   :  { %5191 = vtanh.f32 %v618_v33  ;;  %v4278_v36 = vmul.f32 -1.442695, %v618_v33 }
 0x671   :  { %5193 = vpow2.f32 %v4278_v36 }
 0x679   :  { %v5192_v35 = vpop.eup %5191 }
 0x67a   :  { %628 = vrot.lane.b32.xlu0 %v5192_v35, %s5367_s23  ;;  %v5602_v35 = vadd.f32 %v5494_v50, %v5492_v49 }
 0x67b   :  { %v5194_v37 = vpop.eup %5193 }
 0x67c   :  { %v622_v39 = vadd.f32 1.0, %v5194_v37  ;;  %v270_v36 = vrot.slane %v5602_v35, %v5444_v27  ;;  %v263_v16 = vcombine.high %v5602_v35, %v5602_v35 }
 0x67e   :  { %5195 = vrcp.f32 %v622_v39  ;;  %v277_v17 = vrot.slane %v263_v16, %v5444_v27 }
 0x688   :  { %v5196_v40 = vpop.eup %5195 }
 0x689   :  { %v626_v43 = vmul.f32 %v5196_v40, %v529_v23  ;;  %v135_v23 = vrot.slane %v121_v19, %v5444_v27 }
 0x68b   :  { %v136_v28 = vcombine.low %v128_v22, %v135_v23 }
 0x68d   :  { %4553 = vmatmul.mubr.msk.f32.gmra.mrb[2].mxu0 %vm148_vm1, %v136_v28 }
 0x68e   :  { %4607 = vmatprep.mubr.msk.f32.mxu0 %vm5365_vm0, %v5366_v18 }
 0x6ec   :  { %v629_v41 = vpop.permute.xlu0 %628 }
 0x6ed   :  { %v631_v42 = vmul.f32 %v5196_v40, %v629_v41 }
 0x6ef   :  { %633 = vrot.lane.b32.xlu1 %v631_v42, %s5367_s23 }
 0x760   :  { %v5589_v32 = vpop.f32.mrb[2].mxu0 }
 0x761   :  { %v634_v44 = vpop.permute.xlu1 %633  ;;  %v5591_v33 = vpop.f32.mrb[3].mxu0 }
 0x762   :  { %v636_v45 = vadd.f32 %v634_v44, %v626_v43 }
 0x764   :  { %5197 = vtanh.f32 %v636_v45 }
 0x76e   :  { %v5198_v46 = vpop.eup %5197 }
 0x76f   :  { %639 = vrot.lane.b32.xlu0 %v5198_v46, %s5367_s23 }
 0x7e1   :  { %v640_v47 = vpop.permute.xlu0 %639 }
 0x7e2   :  { %v5537_v48 = vmul.f32 %v5196_v40, %v640_v47 }
 0x7e4   :  { %v650_v51 = vrot.slane %v5537_v48, %v5444_v27 }
 0x7e6   :  { %651 = vrot.lane.b32.xlu1 %v650_v51, %s5368_s24 }
 0x858   :  { %v652_v52 = vpop.permute.xlu1 %651 }
 0x859   :  { %4597 = vmatmul.mubr.msk.f32.vlgmr.msra.gmra.mrb[6].mxu1 %vm330_vm2, %v652_v52 }
 0x85a   :  { %4919 = vmatpush3.bf16.msra.mxu1 %v5432_v20  ;;  %4618 = vmatprep.mubr.msk.f32.mxu1 %vm5365_vm0, %v5366_v18 }
 0x85b   :  { %4920 = vmatprep.subr.bf16.mxu1 %v5363_v6 }
 0x85e   :  { %4922 = vmatpush3.bf16.msra.mxu1 %v5468_v38 }
 0x85f   :  { %4929 = vmatprep.subr.bf16.mxu1 %v5363_v6 }
 0x92c   :  { %v721_v54 = vpop.f32.mrb[6].mxu1 }
 0x92d   :  { %v725_v55 = vadd.f32 %v721_v54, %v262_v53  ;;  %v4598_v56 = vpop.f32.mrb[7].mxu1 }
 0x92f   :  { %5199 = vtanh.f32 %v725_v55  ;;  %v4280_v58 = vmul.f32 -1.442695, %v725_v55 }
 0x931   :  { %5201 = vpow2.f32 %v4280_v58  ;;  %v278_v58 = vcombine.high %v270_v36, %v270_v36 }
 0x939   :  { %v5200_v57 = vpop.eup %5199 }
 0x93a   :  { %735 = vrot.lane.b32.xlu0 %v5200_v57, %s5367_s23 }
 0x93b   :  { %v5202_v59 = vpop.eup %5201 }
 0x93c   :  { %v729_v60 = vadd.f32 1.0, %v5202_v59 }
 0x93e   :  { %5203 = vrcp.f32 %v729_v60 }
 0x948   :  { %v5204_v61 = vpop.eup %5203 }
 0x949   :  { %v733_v0 = vmul.f32 %v5204_v61, %v636_v45 }
 0x9ac   :  { %v736_v62 = vpop.permute.xlu0 %735 }
 0x9ad   :  { %v738_v63 = vmul.f32 %v5204_v61, %v736_v62 }
 0x9af   :  { %740 = vrot.lane.b32.xlu1 %v738_v63, %s5367_s23 }
 0xa21   :  { %v741_v1 = vpop.permute.xlu1 %740 }
 0xa22   :  { %v743_v2 = vadd.f32 %v741_v1, %v733_v0 }
 0xa24   :  { %5205 = vtanh.f32 %v743_v2 }
 0xa2e   :  { %v5206_v24 = vpop.eup %5205 }
 0xa2f   :  { %746 = vrot.lane.b32.xlu0 %v5206_v24, %s5367_s23 }
 0xaa1   :  { %v747_v29 = vpop.permute.xlu0 %746 }
 0xaa2   :  { %v5584_v30 = vmul.f32 %v5204_v61, %v747_v29 }
 0xaa4   :  { %v757_v31 = vrot.slane %v5584_v30, %v5444_v27 }
 0xaa6   :  { %758 = vrot.lane.b32.xlu1 %v757_v31, %s5368_s24 }
 0xb18   :  { %v759_v34 = vpop.permute.xlu1 %758 }
 0xb19   :  { %4608 = vmatmul.mubr.msk.f32.vlgmr.msra.gmra.mrb[4].mxu0 %vm330_vm2, %v759_v34 }
 0xb1a   :  { %4925 = vmatpush3.bf16.msra.mxu0 %v5432_v20  ;;  %4629 = vmatprep.mubr.msk.f32.mxu0 %vm5365_vm0, %v5366_v18 }
 0xb1b   :  { %4926 = vmatprep.subr.bf16.mxu0 %v5363_v6 }
 0xb1e   :  { %4928 = vmatpush3.bf16.msra.mxu0 %v5468_v38 }
 0xb1f   :  { %4935 = vmatprep.subr.bf16.mxu0 %v5363_v6 }
 0xbec   :  { %v828_v37 = vpop.f32.mrb[4].mxu0 }
 0xbed   :  { %v832_v39 = vadd.f32 %v828_v37, %v270_v36  ;;  %v4609_v40 = vpop.f32.mrb[5].mxu0 }
 0xbef   :  { %5207 = vtanh.f32 %v832_v39  ;;  %v4282_v42 = vmul.f32 -1.442695, %v832_v39 }
 0xbf1   :  { %5209 = vpow2.f32 %v4282_v42 }
 0xbf9   :  { %v5208_v41 = vpop.eup %5207 }
 0xbfa   :  { %842 = vrot.lane.b32.xlu0 %v5208_v41, %s5367_s23 }
 0xbfb   :  { %v5210_v43 = vpop.eup %5209 }
 0xbfc   :  { %v836_v44 = vadd.f32 1.0, %v5210_v43 }
 0xbfe   :  { %5211 = vrcp.f32 %v836_v44  ;;  %v279_v44 = vcombine.high %v277_v17, %v277_v17 }
 0xc08   :  { %v5212_v45 = vpop.eup %5211 }
 0xc09   :  { %v840_v50 = vmul.f32 %v5212_v45, %v743_v2 }
 0xc6c   :  { %v843_v46 = vpop.permute.xlu0 %842 }
 0xc6d   :  { %v845_v47 = vmul.f32 %v5212_v45, %v843_v46 }
 0xc6f   :  { %847 = vrot.lane.b32.xlu1 %v845_v47, %s5367_s23 }
 0xce1   :  { %v848_v51 = vpop.permute.xlu1 %847 }
 0xce2   :  { %v850_v52 = vadd.f32 %v848_v51, %v840_v50 }
 0xce4   :  { %5213 = vtanh.f32 %v850_v52 }
 0xcee   :  { %v5214_v53 = vpop.eup %5213 }
 0xcef   :  { %853 = vrot.lane.b32.xlu0 %v5214_v53, %s5367_s23 }
 0xd61   :  { %v854_v54 = vpop.permute.xlu0 %853 }
 0xd62   :  { %v5609_v55 = vmul.f32 %v5212_v45, %v854_v54 }
 0xd64   :  { %v864_v56 = vrot.slane %v5609_v55, %v5444_v27 }
 0xd66   :  { %865 = vrot.lane.b32.xlu1 %v864_v56, %s5368_s24 }
 0xdd8   :  { %v866_v57 = vpop.permute.xlu1 %865 }
 0xdd9   :  { %4619 = vmatmul.mubr.msk.f32.vlgmr.msra.gmra.mrb[8].mxu1 %vm330_vm2, %v866_v57 }
 0xdda   :  { %4931 = vmatpush3.bf16.msra.mxu1 %v5432_v20  ;;  %4640 = vmatprep.mubr.msk.f32.mxu1 %vm5365_vm0, %v5366_v18 }
 0xddb   :  { %4932 = vmatprep.subr.bf16.mxu1 %v5363_v6 }
 0xdde   :  { %4934 = vmatpush3.bf16.msra.mxu1 %v5468_v38 }
 0xddf   :  { %4941 = vmatprep.subr.bf16.mxu1 %v5363_v6 }
 0xeac   :  { %v935_v59 = vpop.f32.mrb[8].mxu1 }
 0xead   :  { %v939_v60 = vadd.f32 %v935_v59, %v278_v58  ;;  %v4620_v61 = vpop.f32.mrb[9].mxu1 }
 0xeaf   :  { %5215 = vtanh.f32 %v939_v60  ;;  %v4284_v63 = vmul.f32 -1.442695, %v939_v60 }
 0xeb1   :  { %5217 = vpow2.f32 %v4284_v63 }
 0xeb9   :  { %v5216_v62 = vpop.eup %5215 }
 0xeba   :  { %949 = vrot.lane.b32.xlu0 %v5216_v62, %s5367_s23 }
 0xebb   :  { %v5218_v0 = vpop.eup %5217 }
 0xebc   :  { %v943_v1 = vadd.f32 1.0, %v5218_v0 }
 0xebe   :  { %5219 = vrcp.f32 %v943_v1 }
 0xec8   :  { %v5220_v2 = vpop.eup %5219 }
 0xec9   :  { %v947_v7 = vmul.f32 %v5220_v2, %v850_v52 }
 0xf2c   :  { %v950_v4 = vpop.permute.xlu0 %949 }
 0xf2d   :  { %v952_v5 = vmul.f32 %v5220_v2, %v950_v4 }
 0xf2f   :  { %954 = vrot.lane.b32.xlu1 %v952_v5, %s5367_s23 }
 0xfa1   :  { %v955_v8 = vpop.permute.xlu1 %954 }
 0xfa2   :  { %v957_v9 = vadd.f32 %v955_v8, %v947_v7 }
 0xfa4   :  { %5221 = vtanh.f32 %v957_v9 }
 0xfae   :  { %v5222_v10 = vpop.eup %5221 }
 0xfaf   :  { %960 = vrot.lane.b32.xlu0 %v5222_v10, %s5367_s23 }
0x1021   :  { %v961_v11 = vpop.permute.xlu0 %960 }
0x1022   :  { %v5624_v12 = vmul.f32 %v5220_v2, %v961_v11  ;;  %v5671_v2 = vadd.f32 %v5591_v33, %v5492_v49 }
0x1024   :  { %v971_v14 = vrot.slane %v5624_v12, %v5444_v27  ;;  %v287_v4 = vrot.slane %v5671_v2, %v5444_v27 }
0x1026   :  { %972 = vrot.lane.b32.xlu1 %v971_v14, %s5368_s24 }
0x1098   :  { %v973_v15 = vpop.permute.xlu1 %972 }
0x1099   :  { %4630 = vmatmul.mubr.msk.f32.vlgmr.msra.gmra.mrb[6].mxu0 %vm330_vm2, %v973_v15 }
0x109a   :  { %4937 = vmatpush3.bf16.msra.mxu0 %v5432_v20  ;;  %4651 = vmatprep.mubr.msk.f32.mxu0 %vm5365_vm0, %v5366_v18 }
0x109b   :  { %4938 = vmatprep.subr.bf16.mxu0 %v5363_v6 }
0x109e   :  { %4940 = vmatpush3.bf16.msra.mxu0 %v5468_v38 }
0x109f   :  { %4947 = vmatprep.subr.bf16.mxu0 %v5363_v6 }
0x116c   :  { %v1042_v19 = vpop.f32.mrb[6].mxu0 }
0x116d   :  { %v1046_v21 = vadd.f32 %v1042_v19, %v277_v17  ;;  %v4631_v22 = vpop.f32.mrb[7].mxu0 }
0x116f   :  { %5223 = vtanh.f32 %v1046_v21  ;;  %v4286_v24 = vmul.f32 -1.442695, %v1046_v21 }
0x1171   :  { %5225 = vpow2.f32 %v4286_v24 }
0x1179   :  { %v5224_v23 = vpop.eup %5223 }
0x117a   :  { %1056 = vrot.lane.b32.xlu0 %v5224_v23, %s5367_s23 }
0x117b   :  { %v5226_v25 = vpop.eup %5225 }
0x117c   :  { %v1050_v28 = vadd.f32 1.0, %v5226_v25 }
0x117e   :  { %5227 = vrcp.f32 %v1050_v28 }
0x1188   :  { %v5228_v29 = vpop.eup %5227 }
0x1189   :  { %v1054_v35 = vmul.f32 %v5228_v29, %v957_v9 }
0x11ec   :  { %v1057_v31 = vpop.permute.xlu0 %1056 }
0x11ed   :  { %v1059_v34 = vmul.f32 %v5228_v29, %v1057_v31 }
0x11ef   :  { %1061 = vrot.lane.b32.xlu1 %v1059_v34, %s5367_s23 }
0x1261   :  { %v1062_v36 = vpop.permute.xlu1 %1061 }
0x1262   :  { %v1064_v37 = vadd.f32 %v1062_v36, %v1054_v35 }
0x1264   :  { %5229 = vtanh.f32 %v1064_v37 }
0x126e   :  { %v5230_v39 = vpop.eup %5229 }
0x126f   :  { %1067 = vrot.lane.b32.xlu0 %v5230_v39, %s5367_s23 }
0x12e1   :  { %v1068_v40 = vpop.permute.xlu0 %1067 }
0x12e2   :  { %v5642_v41 = vmul.f32 %v5228_v29, %v1068_v40  ;;  %v295_v29 = vcombine.high %v287_v4, %v287_v4 }
0x12e4   :  { %v1078_v42 = vrot.slane %v5642_v41, %v5444_v27 }
0x12e6   :  { %1079 = vrot.lane.b32.xlu1 %v1078_v42, %s5368_s24 }
0x1358   :  { %v1080_v43 = vpop.permute.xlu1 %1079 }
0x1359   :  { %4641 = vmatmul.mubr.msk.f32.vlgmr.msra.gmra.mrb[10].mxu1 %vm330_vm2, %v1080_v43 }
0x135a   :  { %4943 = vmatpush3.bf16.msra.mxu1 %v5432_v20  ;;  %4662 = vmatprep.mubr.msk.f32.mxu1 %vm5365_vm0, %v5366_v18 }
0x135b   :  { %4944 = vmatprep.subr.bf16.mxu1 %v5363_v6 }
0x135e   :  { %4946 = vmatpush3.bf16.msra.mxu1 %v5468_v38 }
0x135f   :  { %4953 = vmatprep.subr.bf16.mxu1 %v5363_v6 }
0x142c   :  { %v1149_v45 = vpop.f32.mrb[10].mxu1 }
0x142d   :  { %v1153_v46 = vadd.f32 %v1149_v45, %v279_v44  ;;  %v4642_v47 = vpop.f32.mrb[11].mxu1 }
0x142f   :  { %5231 = vtanh.f32 %v1153_v46  ;;  %v4288_v51 = vmul.f32 -1.442695, %v1153_v46 }
0x1431   :  { %5233 = vpow2.f32 %v4288_v51  ;;  %v5369_v51 = vmov 1966171168  }
0x1439   :  { %v5232_v50 = vpop.eup %5231 }
0x143a   :  { %1163 = vrot.lane.b32.xlu0 %v5232_v50, %s5367_s23 }
0x143b   :  { %v5234_v52 = vpop.eup %5233 }
0x143c   :  { %v1157_v53 = vadd.f32 1.0, %v5234_v52  ;;  %v2035_v52 = vunpack.c.l.s4 %v5369_v51 }
0x143e   :  { %5235 = vrcp.f32 %v1157_v53  ;;  %v2036_v53 = vunpack.c.0.s8 %v2035_v52 }
0x1448   :  { %v5236_v54 = vpop.eup %5235 }
0x1449   :  { %v1161_v58 = vmul.f32 %v5236_v54, %v1064_v37 }
0x14ac   :  { %v1164_v56 = vpop.permute.xlu0 %1163 }
0x14ad   :  { %v1166_v57 = vmul.f32 %v5236_v54, %v1164_v56  ;;  %v5691_v56 = vsub.s32 %v2036_v53, %v5416_v13 }
0x14af   :  { %1168 = vrot.lane.b32.xlu1 %v1166_v57, %s5367_s23 }
0x1521   :  { %v1169_v59 = vpop.permute.xlu1 %1168 }
0x1522   :  { %v1171_v60 = vadd.f32 %v1169_v59, %v1161_v58  ;;  %v5694_v58 = vsub.s32 0, %v5416_v13 }
0x1524   :  { %5237 = vtanh.f32 %v1171_v60 }
0x152e   :  { %v5238_v61 = vpop.eup %5237 }
0x152f   :  { %1174 = vrot.lane.b32.xlu0 %v5238_v61, %s5367_s23 }
0x15a1   :  { %v1175_v62 = vpop.permute.xlu0 %1174 }
0x15a2   :  { %v5657_v63 = vmul.f32 %v5236_v54, %v1175_v62 }
0x15a4   :  { %v1185_v0 = vrot.slane %v5657_v63, %v5444_v27 }
0x15a6   :  { %1186 = vrot.lane.b32.xlu1 %v1185_v0, %s5368_s24 }
0x1618   :  { %v1187_v1 = vpop.permute.xlu1 %1186 }
0x1619   :  { %4652 = vmatmul.mubr.msk.f32.vlgmr.msra.gmra.mrb[8].mxu0 %vm330_vm2, %v1187_v1 }
0x161a   :  { %4949 = vmatpush3.bf16.msra.mxu0 %v5432_v20  ;;  %4673 = vmatprep.mubr.msk.f32.mxu0 %vm5365_vm0, %v5366_v18 }
0x161b   :  { %4950 = vmatprep.subr.bf16.mxu0 %v5363_v6 }
0x161e   :  { %4952 = vmatpush3.bf16.msra.mxu0 %v5468_v38 }
0x161f   :  { %4959 = vmatprep.subr.bf16.mxu0 %v5363_v6 }
0x16ec   :  { %v1256_v5 = vpop.f32.mrb[8].mxu0 }
0x16ed   :  { %v1260_v7 = vadd.f32 %v1256_v5, %v287_v4  ;;  %v4653_v8 = vpop.f32.mrb[9].mxu0 }
0x16ee   :  { %v280_v8 = vcombine.high %v5671_v2, %v5671_v2 }
0x16ef   :  { %5239 = vtanh.f32 %v1260_v7  ;;  %v4290_v10 = vmul.f32 -1.442695, %v1260_v7 }
0x16f1   :  { %5241 = vpow2.f32 %v4290_v10 }
0x16f9   :  { %v5240_v9 = vpop.eup %5239 }
0x16fa   :  { %1270 = vrot.lane.b32.xlu0 %v5240_v9, %s5367_s23  ;;  %v294_v9 = vrot.slane %v280_v8, %v5444_v27 }
0x16fb   :  { %v5242_v11 = vpop.eup %5241 }
0x16fc   :  { %v1264_v14 = vadd.f32 1.0, %v5242_v11 }
0x16fe   :  { %5243 = vrcp.f32 %v1264_v14 }
0x1708   :  { %v5244_v15 = vpop.eup %5243 }
0x1709   :  { %v1268_v33 = vmul.f32 %v5244_v15, %v1171_v60 }
0x176c   :  { %v1271_v16 = vpop.permute.xlu0 %1270 }
0x176d   :  { %v1273_v17 = vmul.f32 %v5244_v15, %v1271_v16 }
0x176f   :  { %1275 = vrot.lane.b32.xlu1 %v1273_v17, %s5367_s23 }
0x17e1   :  { %v1276_v19 = vpop.permute.xlu1 %1275 }
0x17e2   :  { %v1278_v21 = vadd.f32 %v1276_v19, %v1268_v33 }
0x17e4   :  { %5245 = vtanh.f32 %v1278_v21 }
0x17ee   :  { %v5246_v22 = vpop.eup %5245 }
0x17ef   :  { %1281 = vrot.lane.b32.xlu0 %v5246_v22, %s5367_s23 }
0x1861   :  { %v1282_v23 = vpop.permute.xlu0 %1281 }
0x1862   :  { %v1284_v24 = vmul.f32 %v5244_v15, %v1282_v23 }
0x1864   :  { %v1292_v25 = vrot.slane %v1284_v24, %v5444_v27  ;;  %v5697_v59 = vrot.slane %v1284_v24, %v5691_v56 }
0x1866   :  { %1293 = vrot.lane.b32.xlu1 %v1292_v25, %s5368_s24  ;;  %v5707_v1 = vcombine.high %v5697_v59, %v5697_v59 }
0x18d8   :  { %v1294_v28 = vpop.permute.xlu1 %1293 }
0x18d9   :  { %4663 = vmatmul.mubr.msk.f32.vlgmr.msra.gmra.mrb[12].mxu1 %vm330_vm2, %v1294_v28 }
0x18da   :  { %4955 = vmatpush3.bf16.msra.mxu1 %v5432_v20  ;;  %4684 = vmatprep.mubr.msk.f32.mxu1 %vm5365_vm0, %v5366_v18 }
0x18db   :  { %4956 = vmatprep.subr.bf16.mxu1 %v5363_v6 }
0x18de   :  { %4958 = vmatpush3.bf16.msra.mxu1 %v5468_v38 }
0x18df   :  { %4965 = vmatprep.subr.bf16.mxu1 %v5363_v6 }
0x19ac   :  { %v1363_v31 = vpop.f32.mrb[12].mxu1 }
0x19ad   :  { %v1367_v34 = vadd.f32 %v1363_v31, %v295_v29  ;;  %v4664_v35 = vpop.f32.mrb[13].mxu1 }
0x19af   :  { %5247 = vtanh.f32 %v1367_v34  ;;  %v4292_v37 = vmul.f32 -1.442695, %v1367_v34 }
0x19b1   :  { %5249 = vpow2.f32 %v4292_v37 }
0x19b9   :  { %v5248_v36 = vpop.eup %5247 }
0x19ba   :  { %1377 = vrot.lane.b32.xlu0 %v5248_v36, %s5367_s23 }
0x19bb   :  { %v5250_v39 = vpop.eup %5249 }
0x19bc   :  { %v1371_v40 = vadd.f32 1.0, %v5250_v39 }
0x19be   :  { %5251 = vrcp.f32 %v1371_v40 }
0x19c8   :  { %v5252_v42 = vpop.eup %5251 }
0x19c9   :  { %v1375_v45 = vmul.f32 %v5252_v42, %v1278_v21 }
0x1a2c   :  { %v1378_v43 = vpop.permute.xlu0 %1377 }
0x1a2d   :  { %v1380_v44 = vmul.f32 %v5252_v42, %v1378_v43  ;;  %v296_v43 = vcombine.high %v294_v9, %v294_v9 }
0x1a2f   :  { %1382 = vrot.lane.b32.xlu1 %v1380_v44, %s5367_s23 }
0x1aa1   :  { %v1383_v46 = vpop.permute.xlu1 %1382 }
0x1aa2   :  { %v1385_v47 = vadd.f32 %v1383_v46, %v1375_v45 }
0x1aa4   :  { %5253 = vtanh.f32 %v1385_v47 }
0x1aae   :  { %v5254_v50 = vpop.eup %5253 }
0x1aaf   :  { %1388 = vrot.lane.b32.xlu0 %v5254_v50, %s5367_s23 }
0x1b21   :  { %v1389_v54 = vpop.permute.xlu0 %1388 }
0x1b22   :  { %v1391_v57 = vmul.f32 %v5252_v42, %v1389_v54 }
0x1b24   :  { %v1399_v60 = vrot.slane %v1391_v57, %v5444_v27  ;;  %v2118_v61 = vrot.slane %v1391_v57, %v5691_v56 }
0x1b26   :  { %v2119_v62 = vcombine.high %v2118_v61, %v2118_v61  ;;  %v5702_v0 = vrot.slane %v2118_v61, %v5694_v58  ;;  %1400 = vrot.lane.b32.xlu1 %v1399_v60, %s5368_s24 }
0x1b28   :  { %v5710_v13 = vrot.slane %v2119_v62, %v5694_v58  ;;  %v2332_v4 = vsel %vm2311_vm3, %v5697_v59, %v5702_v0 }
0x1b2a   :  { %v2333_v5 = vsel %vm2311_vm3, %v5707_v1, %v5710_v13 }
0x1b98   :  { %v1401_v7 = vpop.permute.xlu1 %1400 }
0x1b99   :  { %4674 = vmatmul.mubr.msk.f32.vlgmr.msra.gmra.mrb[10].mxu0 %vm330_vm2, %v1401_v7 }
0x1b9a   :  { %4961 = vmatpush3.bf16.msra.mxu0 %v5432_v20  ;;  %4695 = vmatprep.mubr.msk.f32.mxu0 %vm5365_vm0, %v5366_v18 }
0x1b9b   :  { %4962 = vmatprep.subr.bf16.mxu0 %v5363_v6 }
0x1b9e   :  { %4964 = vmatpush3.bf16.msra.mxu0 %v5468_v38 }
0x1b9f   :  { %4971 = vmatprep.subr.bf16.mxu0 %v5363_v6 }
0x1c6c   :  { %v1470_v10 = vpop.f32.mrb[10].mxu0 }
0x1c6d   :  { %v1474_v11 = vadd.f32 %v1470_v10, %v294_v9  ;;  %v4675_v14 = vpop.f32.mrb[11].mxu0 }
0x1c6f   :  { %5255 = vtanh.f32 %v1474_v11  ;;  %v4294_v16 = vmul.f32 -1.442695, %v1474_v11 }
0x1c71   :  { %5257 = vpow2.f32 %v4294_v16 }
0x1c79   :  { %v5256_v15 = vpop.eup %5255 }
0x1c7a   :  { %1484 = vrot.lane.b32.xlu0 %v5256_v15, %s5367_s23 }
0x1c7b   :  { %v5258_v17 = vpop.eup %5257 }
0x1c7c   :  { %v1478_v33 = vadd.f32 1.0, %v5258_v17 }
0x1c7e   :  { %5259 = vrcp.f32 %v1478_v33  ;;  %v5775_v33 = vadd.f32 %v5589_v32, %v5492_v49 }
0x1c88   :  { %v5260_v19 = vpop.eup %5259 }
0x1c89   :  { %v1482_v2 = vmul.f32 %v5260_v19, %v1385_v47 }
0x1cec   :  { %v1485_v21 = vpop.permute.xlu0 %1484 }
0x1ced   :  { %v1487_v22 = vmul.f32 %v5260_v19, %v1485_v21 }
0x1cef   :  { %1489 = vrot.lane.b32.xlu1 %v1487_v22, %s5367_s23 }
0x1d61   :  { %v1490_v23 = vpop.permute.xlu1 %1489 }
0x1d62   :  { %v1492_v24 = vadd.f32 %v1490_v23, %v1482_v2 }
0x1d64   :  { %5261 = vtanh.f32 %v1492_v24 }
0x1d6e   :  { %v5262_v25 = vpop.eup %5261 }
0x1d6f   :  { %1495 = vrot.lane.b32.xlu0 %v5262_v25, %s5367_s23 }
0x1de1   :  { %v1496_v28 = vpop.permute.xlu0 %1495 }
0x1de2   :  { %v1498_v29 = vmul.f32 %v5260_v19, %v1496_v28  ;;  %v304_v19 = vrot.slane %v5775_v33, %v5444_v27 }
0x1de4   :  { %v1506_v31 = vrot.slane %v1498_v29, %v5444_v27  ;;  %v2126_v34 = vrot.slane %v1498_v29, %v5691_v56 }
0x1de6   :  { %v2127_v35 = vcombine.high %v2126_v34, %v2126_v34  ;;  %v5734_v36 = vrot.slane %v2126_v34, %v5694_v58  ;;  %1507 = vrot.lane.b32.xlu1 %v1506_v31, %s5368_s24 }
0x1de8   :  { %v5738_v37 = vrot.slane %v2127_v35, %v5694_v58  ;;  %v2334_v39 = vsel %vm2314_vm4, %v2332_v4, %v5734_v36 }
0x1dea   :  { %v2335_v40 = vsel %vm2314_vm4, %v2333_v5, %v5738_v37 }
0x1e58   :  { %v1508_v42 = vpop.permute.xlu1 %1507 }
0x1e59   :  { %4685 = vmatmul.mubr.msk.f32.vlgmr.msra.gmra.mrb[14].mxu1 %vm330_vm2, %v1508_v42 }
0x1e5a   :  { %4967 = vmatpush3.bf16.msra.mxu1 %v5432_v20  ;;  %4706 = vmatprep.mubr.msk.f32.mxu1 %vm5365_vm0, %v5366_v18 }
0x1e5b   :  { %4968 = vmatprep.subr.bf16.mxu1 %v5363_v6 }
0x1e5e   :  { %4970 = vmatpush3.bf16.msra.mxu1 %v5468_v38 }
0x1e5f   :  { %4977 = vmatprep.subr.bf16.mxu1 %v5363_v6 }
0x1f2c   :  { %v1577_v44 = vpop.f32.mrb[14].mxu1 }
0x1f2d   :  { %v1581_v45 = vadd.f32 %v1577_v44, %v296_v43  ;;  %v4686_v46 = vpop.f32.mrb[15].mxu1 }
0x1f2f   :  { %5263 = vtanh.f32 %v1581_v45  ;;  %v4296_v50 = vmul.f32 -1.442695, %v1581_v45 }
0x1f31   :  { %5265 = vpow2.f32 %v4296_v50 }
0x1f39   :  { %v5264_v47 = vpop.eup %5263 }
0x1f3a   :  { %1591 = vrot.lane.b32.xlu0 %v5264_v47, %s5367_s23 }
0x1f3b   :  { %v5266_v51 = vpop.eup %5265 }
0x1f3c   :  { %v1585_v52 = vadd.f32 1.0, %v5266_v51 }
0x1f3e   :  { %5267 = vrcp.f32 %v1585_v52 }
0x1f48   :  { %v5268_v53 = vpop.eup %5267 }
0x1f49   :  { %v1589_v60 = vmul.f32 %v5268_v53, %v1492_v24 }
0x1fac   :  { %v1592_v54 = vpop.permute.xlu0 %1591 }
0x1fad   :  { %v1594_v57 = vmul.f32 %v5268_v53, %v1592_v54 }
0x1faf   :  { %1596 = vrot.lane.b32.xlu1 %v1594_v57, %s5367_s23 }
0x2021   :  { %v1597_v61 = vpop.permute.xlu1 %1596 }
0x2022   :  { %v1599_v62 = vadd.f32 %v1597_v61, %v1589_v60 }
0x2024   :  { %5269 = vtanh.f32 %v1599_v62 }
0x202e   :  { %v5270_v4 = vpop.eup %5269 }
0x202f   :  { %1602 = vrot.lane.b32.xlu0 %v5270_v4, %s5367_s23 }
0x20a1   :  { %v1603_v5 = vpop.permute.xlu0 %1602 }
0x20a2   :  { %v1605_v7 = vmul.f32 %v5268_v53, %v1603_v5  ;;  %v312_v53 = vcombine.high %v304_v19, %v304_v19 }
0x20a4   :  { %v1613_v8 = vrot.slane %v1605_v7, %v5444_v27  ;;  %v2134_v9 = vrot.slane %v1605_v7, %v5691_v56 }
0x20a6   :  { %v2135_v10 = vcombine.high %v2134_v9, %v2134_v9  ;;  %v5757_v11 = vrot.slane %v2134_v9, %v5694_v58  ;;  %1614 = vrot.lane.b32.xlu1 %v1613_v8, %s5368_s24 }
0x20a8   :  { %v5761_v14 = vrot.slane %v2135_v10, %v5694_v58  ;;  %v2336_v15 = vsel %vm2317_vm5, %v2334_v39, %v5757_v11 }
0x20aa   :  { %v2337_v16 = vsel %vm2317_vm5, %v2335_v40, %v5761_v14 }
0x2118   :  { %v1615_v17 = vpop.permute.xlu1 %1614 }
0x2119   :  { %4696 = vmatmul.mubr.msk.f32.vlgmr.msra.gmra.mrb[12].mxu0 %vm330_vm2, %v1615_v17 }
0x211a   :  { %4973 = vmatpush3.bf16.msra.mxu0 %v5432_v20  ;;  %4717 = vmatprep.mubr.msk.f32.mxu0 %vm5365_vm0, %v5366_v18 }
0x211b   :  { %4974 = vmatprep.subr.bf16.mxu0 %v5363_v6 }
0x211e   :  { %4976 = vmatpush3.bf16.msra.mxu0 %v5468_v38 }
0x21ec   :  { %v1684_v21 = vpop.f32.mrb[12].mxu0 }
0x21ed   :  { %v1688_v22 = vadd.f32 %v1684_v21, %v304_v19  ;;  %v4697_v2 = vpop.f32.mrb[13].mxu0 }
0x21ef   :  { %5271 = vtanh.f32 %v1688_v22  ;;  %v4298_v24 = vmul.f32 -1.442695, %v1688_v22 }
0x21f1   :  { %5273 = vpow2.f32 %v4298_v24 }
0x21f9   :  { %v5272_v23 = vpop.eup %5271 }
0x21fa   :  { %1698 = vrot.lane.b32.xlu0 %v5272_v23, %s5367_s23 }
0x21fb   :  { %v5274_v25 = vpop.eup %5273 }
0x21fc   :  { %v1692_v28 = vadd.f32 1.0, %v5274_v25  ;;  %v297_v25 = vcombine.high %v5775_v33, %v5775_v33 }
0x21fe   :  { %5275 = vrcp.f32 %v1692_v28  ;;  %v311_v28 = vrot.slane %v297_v25, %v5444_v27 }
0x2208   :  { %v5276_v29 = vpop.eup %5275 }
0x2209   :  { %v1696_v49 = vmul.f32 %v5276_v29, %v1599_v62 }
0x226c   :  { %v1699_v31 = vpop.permute.xlu0 %1698 }
0x226d   :  { %v1701_v34 = vmul.f32 %v5276_v29, %v1699_v31 }
0x226f   :  { %1703 = vrot.lane.b32.xlu1 %v1701_v34, %s5367_s23 }
0x22e1   :  { %v1704_v32 = vpop.permute.xlu1 %1703 }
0x22e2   :  { %v1706_v35 = vadd.f32 %v1704_v32, %v1696_v49 }
0x22e4   :  { %5277 = vtanh.f32 %v1706_v35 }
0x22ee   :  { %v5278_v39 = vpop.eup %5277 }
0x22ef   :  { %1709 = vrot.lane.b32.xlu0 %v5278_v39, %s5367_s23 }
0x2361   :  { %v1710_v40 = vpop.permute.xlu0 %1709 }
0x2362   :  { %v1712_v42 = vmul.f32 %v5276_v29, %v1710_v40 }
0x2364   :  { %v1720_v43 = vrot.slane %v1712_v42, %v5444_v27  ;;  %v2142_v44 = vrot.slane %v1712_v42, %v5691_v56 }
0x2366   :  { %v2143_v45 = vcombine.high %v2142_v44, %v2142_v44  ;;  %v5785_v46 = vrot.slane %v2142_v44, %v5694_v58  ;;  %1721 = vrot.lane.b32.xlu1 %v1720_v43, %s5368_s24 }
0x2368   :  { %v5789_v47 = vrot.slane %v2143_v45, %v5694_v58  ;;  %v2338_v50 = vsel %vm2320_vm6, %v2336_v15, %v5785_v46 }
0x236a   :  { %v2339_v51 = vsel %vm2320_vm6, %v2337_v16, %v5789_v47 }
0x23d8   :  { %v1722_v52 = vpop.permute.xlu1 %1721 }
0x23d9   :  { %4707 = vmatmul.mubr.msk.f32.vlgmr.msra.gmra.mrb[16].mxu1 %vm330_vm2, %v1722_v52 }
0x23da   :  { %4979 = vmatpush3.bf16.msra.mxu1 %v5432_v20  ;;  %4728 = vmatprep.mubr.msk.f32.mxu1 %vm5365_vm0, %v5366_v18 }
0x23db   :  { %4980 = vmatprep.subr.bf16.mxu1 %v5363_v6 }
0x23de   :  { %4982 = vmatpush3.bf16.msra.mxu1 %v5468_v38 }
0x24ac   :  { %v1791_v54 = vpop.f32.mrb[16].mxu1 }
0x24ad   :  { %v1795_v57 = vadd.f32 %v1791_v54, %v312_v53  ;;  %v4708_v60 = vpop.f32.mrb[17].mxu1 }
0x24af   :  { %5279 = vtanh.f32 %v1795_v57  ;;  %v4300_v62 = vmul.f32 -1.442695, %v1795_v57 }
0x24b1   :  { %5281 = vpow2.f32 %v4300_v62 }
0x24b9   :  { %v5280_v61 = vpop.eup %5279 }
0x24ba   :  { %1805 = vrot.lane.b32.xlu0 %v5280_v61, %s5367_s23 }
0x24bb   :  { %v5282_v4 = vpop.eup %5281 }
0x24bc   :  { %v1799_v5 = vadd.f32 1.0, %v5282_v4 }
0x24be   :  { %5283 = vrcp.f32 %v1799_v5  ;;  %v313_v5 = vcombine.high %v311_v28, %v311_v28 }
0x24c8   :  { %v5284_v20 = vpop.eup %5283 }
0x24c9   :  { %v1803_v6 = vmul.f32 %v5284_v20, %v1706_v35 }
0x252c   :  { %v1806_v7 = vpop.permute.xlu0 %1805 }
0x252d   :  { %v1808_v18 = vmul.f32 %v5284_v20, %v1806_v7 }
0x252f   :  { %1810 = vrot.lane.b32.xlu1 %v1808_v18, %s5367_s23 }
0x25a1   :  { %v1811_v38 = vpop.permute.xlu1 %1810 }
0x25a2   :  { %v1813_v8 = vadd.f32 %v1811_v38, %v1803_v6 }
0x25a4   :  { %5285 = vtanh.f32 %v1813_v8 }
0x25ae   :  { %v5286_v9 = vpop.eup %5285 }
0x25af   :  { %1816 = vrot.lane.b32.xlu0 %v5286_v9, %s5367_s23 }
0x2621   :  { %v1817_v10 = vpop.permute.xlu0 %1816 }
0x2622   :  { %v1819_v15 = vmul.f32 %v5284_v20, %v1817_v10  ;;  %v2050_v10 = vrot.slane %v5519_v26, %v5691_v56  ;;  %v2082_v26 = vrot.slane %v5624_v12, %v5691_v56 }
0x2624   :  { %v1827_v16 = vrot.slane %v1819_v15, %v5444_v27  ;;  %v2150_v17 = vrot.slane %v1819_v15, %v5691_v56  ;;  %v2058_v15 = vrot.slane %v5537_v48, %v5691_v56  ;;  %v2090_v48 = vrot.slane %v5642_v41, %v5691_v56 }
0x2626   :  { %v2151_v19 = vcombine.high %v2150_v17, %v2150_v17  ;;  %v5807_v21 = vrot.slane %v2150_v17, %v5694_v58  ;;  %1828 = vrot.lane.b32.xlu1 %v1827_v16, %s5368_s24  ;;  %v2066_v16 = vrot.slane %v5584_v30, %v5691_v56  ;;  %v5854_v17 = vrot.slane %v5504_v3, %v5691_v56 }
0x2627   :  { %v2184_v25 = vrot.slane %v2058_v15, %v5694_v58  ;;  %v2098_v3 = vrot.slane %v5657_v63, %v5691_v56  ;;  %v2214_v63 = vrot.slane %v2082_v26, %v5694_v58 }
0x2628   :  { %v5811_v22 = vrot.slane %v2151_v19, %v5694_v58  ;;  %v2340_v2 = vsel %vm2323_vm7, %v2338_v50, %v5807_v21  ;;  %v2051_v19 = vcombine.high %v2050_v10, %v2050_v10  ;;  %v2067_v30 = vcombine.high %v2066_v16, %v2066_v16 }
0x262a   :  { %v2341_v23 = vsel %vm2323_vm7, %v2339_v51, %v5811_v22 }
0x2698   :  { %v1829_v24 = vpop.permute.xlu1 %1828 }
0x2699   :  { %4718 = vmatmul.mubr.msk.f32.vlgmr.msra.gmra.mrb[14].mxu0 %vm330_vm2, %v1829_v24  ;;  %v2059_v24 = vcombine.high %v2058_v15, %v2058_v15 }
0x276c   :  { %v1898_v29 = vpop.f32.mrb[14].mxu0 }
0x276d   :  { %v1902_v31 = vadd.f32 %v1898_v29, %v311_v28  ;;  %v4719_v34 = vpop.f32.mrb[15].mxu0  ;;  %v2194_v28 = vrot.slane %v2066_v16, %v5694_v58  ;;  %v5872_v29 = vrot.slane %v2051_v19, %v5694_v58 }
0x276f   :  { %5287 = vtanh.f32 %v1902_v31  ;;  %v4302_v32 = vmul.f32 -1.442695, %v1902_v31 }
0x2771   :  { %5289 = vpow2.f32 %v4302_v32  ;;  %v2083_v32 = vcombine.high %v2082_v26, %v2082_v26 }
0x2779   :  { %v5288_v49 = vpop.eup %5287 }
0x277a   :  { %1912 = vrot.lane.b32.xlu0 %v5288_v49, %s5367_s23  ;;  %v5878_v49 = vrot.slane %v2059_v24, %v5694_v58 }
0x277b   :  { %v5290_v35 = vpop.eup %5289 }
0x277c   :  { %v1906_v39 = vadd.f32 1.0, %v5290_v35 }
0x277e   :  { %5291 = vrcp.f32 %v1906_v39 }
0x2788   :  { %v5292_v40 = vpop.eup %5291 }
0x2789   :  { %v1910_v33 = vmul.f32 %v5292_v40, %v1813_v8 }
0x27ec   :  { %v1913_v42 = vpop.permute.xlu0 %1912 }
0x27ed   :  { %v1915_v43 = vmul.f32 %v5292_v40, %v1913_v42  ;;  %v2224_v42 = vrot.slane %v2090_v48, %v5694_v58 }
0x27ef   :  { %1917 = vrot.lane.b32.xlu1 %v1915_v43, %s5367_s23  ;;  %v2380_v16 = vsel %vm2311_vm3, %v2098_v3, %v2224_v42 }
0x27f0   :  { %v2382_v26 = vsel %vm2314_vm4, %v2380_v16, %v2214_v63 }
0x2861   :  { %v1918_v44 = vpop.permute.xlu1 %1917 }
0x2862   :  { %v5823_v45 = vadd.f32 %v1918_v44, %v1910_v33  ;;  %v5884_v33 = vrot.slane %v2067_v30, %v5694_v58 }
0x2864   :  { %5293 = vtanh.f32 %v5823_v45 }
0x286e   :  { %v5294_v50 = vpop.eup %5293 }
0x286f   :  { %1923 = vrot.lane.b32.xlu0 %v5294_v50, %s5367_s23  ;;  %v2099_v50 = vcombine.high %v2098_v3, %v2098_v3 }
0x28e1   :  { %v1924_v51 = vpop.permute.xlu0 %1923 }
0x28e2   :  { %v1926_v52 = vmul.f32 %v5292_v40, %v1924_v51  ;;  %v2091_v40 = vcombine.high %v2090_v48, %v2090_v48  ;;  %v2234_v51 = vrot.slane %v2098_v3, %v5694_v58  ;;  %v2359_v3 = vrot.slane %v5854_v17, %v5694_v58 }
0x28e4   :  { %v1934_v53 = vrot.slane %v1926_v52, %v5444_v27  ;;  %v2158_v54 = vrot.slane %v1926_v52, %v5691_v56 }
0x28e6   :  { %v2159_v57 = vcombine.high %v2158_v54, %v2158_v54  ;;  %v5830_v60 = vrot.slane %v2158_v54, %v5694_v58  ;;  %1935 = vrot.lane.b32.xlu1 %v1934_v53, %s5368_s24 }
0x28e8   :  { %v5834_v61 = vrot.slane %v2159_v57, %v5694_v58  ;;  %v5838_v62 = vsel %vm2326_vm8, %v2340_v2, %v5830_v60  ;;  %v2074_v2 = vrot.slane %v5609_v55, %v5691_v56  ;;  %v5869_v55 = vcombine.high %v5854_v17, %v5854_v17 }
0x28e9   :  { %v2218_v57 = vrot.slane %v2083_v32, %v5694_v58 }
0x28ea   :  { %v5842_v4 = vsel %vm2326_vm8, %v2341_v23, %v5834_v61  ;;  %v2174_v23 = vrot.slane %v2050_v10, %v5694_v58  ;;  %v2075_v31 = vcombine.high %v2074_v2, %v2074_v2  ;;  %v2204_v12 = vrot.slane %v2074_v2, %v5694_v58 }
0x28eb   :  { %v2313_v54 = vsel %vm2311_vm3, %v5869_v55, %v5872_v29 }
0x28ec   :  { %v2312_v41 = vsel %vm2311_vm3, %v5854_v17, %v2174_v23  ;;  %v2208_v52 = vrot.slane %v2075_v31, %v5694_v58  ;;  %v2384_v48 = vsel %vm2317_vm5, %v2382_v26, %v2204_v12  ;;  %v44_v17 = vld [vmem:[%s6254_s1 + $0x80] sm:$0xff] }
0x28ed   :  { %v2315_v39 = vsel %vm2314_vm4, %v2312_v41, %v2184_v25  ;;  %v2386_v30 = vsel %vm2320_vm6, %v2384_v48, %v2194_v28 }
0x28ee   :  { %v2318_v44 = vsel %vm2317_vm5, %v2315_v39, %v2194_v28  ;;  %v2388_v31 = vsel %vm2323_vm7, %v2386_v30, %v2184_v25  ;;  %v42_v25 = vld [vmem:[%s6254_s1 + $0x70] sm:$0xff] }
0x28ef   :  { %v2321_v53 = vsel %vm2320_vm6, %v2318_v44, %v2204_v12  ;;  %v2390_v32 = vsel %vm2326_vm8, %v2388_v31, %v2174_v23  ;;  %v41_v12 = vld [vmem:[%s6254_s1 + $0x68] sm:$0xff]  ;;  %v43_v23 = vld [vmem:[%s6254_s1 + $0x78] sm:$0xff] }
0x28f0   :  { %v4983_v28 = vpack.c.bf16 %v42_v25, %v41_v12 }
0x28f2   :  { %4984 = vmatprep.subr.bf16.mxu0 %v4983_v28 }
0x28f3   :  { %4986 = vmatpush3.bf16.msra.mxu0 %v4983_v28 }
0x2958   :  { %v1936_v27 = vpop.permute.xlu1 %1935 }
0x2959   :  { %4729 = vmatmul.mubr.msk.f32.vlgmr.msra.gmra.mrb[18].mxu1 %vm330_vm2, %v1936_v27  ;;  %v2324_v27 = vsel %vm2323_vm7, %v2321_v53, %v2214_v63  ;;  %v4987_v63 = vpack.c.bf16 %v44_v17, %v43_v23 }
0x295b   :  { %4988 = vmatprep.subr.bf16.mxu0 %v4987_v63 }
0x295c   :  { %4990 = vmatpush3.bf16.msra.mxu0 %v4987_v63 }
0x2a2c   :  { %v2005_v20 = vpop.f32.mrb[18].mxu1 }
0x2a2d   :  { %v2009_v7 = vadd.f32 %v2005_v20, %v313_v5  ;;  %v4730_v18 = vpop.f32.mrb[19].mxu1  ;;  %v2316_v5 = vsel %vm2314_vm4, %v2313_v54, %v5878_v49  ;;  %v2228_v20 = vrot.slane %v2091_v40, %v5694_v58 }
0x2a2f   :  { %5295 = vtanh.f32 %v2009_v7  ;;  %v4304_v38 = vmul.f32 -1.442695, %v2009_v7  ;;  %v2327_v7 = vsel %vm2326_vm8, %v2324_v27, %v2224_v42 }
0x2a30   :  { %v2330_v18 = vsel %vm2329_vm9, %v2327_v7, %v2234_v51 }
0x2a31   :  { %5297 = vpow2.f32 %v4304_v38  ;;  %v2319_v38 = vsel %vm2317_vm5, %v2316_v5, %v5884_v33 }
0x2a39   :  { %v5296_v6 = vpop.eup %5295 }
0x2a3a   :  { %2019 = vrot.lane.b32.xlu0 %v5296_v6, %s5367_s23  ;;  %v2238_v6 = vrot.slane %v2099_v50, %v5694_v58 }
0x2a3b   :  { %v5298_v8 = vpop.eup %5297 }
0x2a3c   :  { %v2013_v9 = vadd.f32 1.0, %v5298_v8  ;;  %v2322_v8 = vsel %vm2320_vm6, %v2319_v38, %v2208_v52 }
0x2a3e   :  { %5299 = vrcp.f32 %v2013_v9  ;;  %v2325_v9 = vsel %vm2323_vm7, %v2322_v8, %v2218_v57 }
0x2a3f   :  { %v2328_v10 = vsel %vm2326_vm8, %v2325_v9, %v2228_v20 }
0x2a40   :  { %v2331_v15 = vsel %vm2329_vm9, %v2328_v10, %v2238_v6 }
0x2a48   :  { %v5300_v34 = vpop.eup %5299 }
0x2a49   :  { %v2017_v19 = vmul.f32 %v5300_v34, %v5823_v45  ;;  %v2392_v45 = vsel %vm2329_vm9, %v2390_v32, %v2359_v3 }
0x2aac   :  { %v2020_v35 = vpop.permute.xlu0 %2019 }
0x2aad   :  { %v2022_v43 = vmul.f32 %v5300_v34, %v2020_v35  ;;  %v2381_v35 = vsel %vm2311_vm3, %v2099_v50, %v2228_v20 }
0x2aaf   :  { %2024 = vrot.lane.b32.xlu1 %v2022_v43, %s5367_s23  ;;  %v2383_v43 = vsel %vm2314_vm4, %v2381_v35, %v2218_v57 }
0x2ab0   :  { %v2385_v27 = vsel %vm2317_vm5, %v2383_v43, %v2208_v52  ;;  %v2349_v52 = vrot.slane %v5697_v59, %v5694_v58 }
0x2ab3   :  { %2398 = vrot.lane.b32.xlu1 %v2330_v18, %s5368_s24 }
0x2ab7   :  { %2402 = vrot.lane.b32.xlu1 %v2331_v15, %s5368_s24 }
0x2b21   :  { %v2025_v2 = vpop.permute.xlu1 %2024 }
0x2b22   :  { %v2027_v24 = vadd.f32 %v2025_v2, %v2017_v19 }
0x2b24   :  { %5301 = vtanh.f32 %v2027_v24 }
0x2b25   :  { %v2399_v20 = vpop.permute.xlu1 %2398 }
0x2b29   :  { %v2403_v7 = vpop.permute.xlu1 %2402 }
0x2b2e   :  { %v5302_v41 = vpop.eup %5301 }
0x2b2f   :  { %2030 = vrot.lane.b32.xlu0 %v5302_v41, %s5367_s23  ;;  %s5373_s23 = smov 96  }
0x2b33   :  { %2416 = vrot.lane.b32.xlu0 %v2392_v45, %s5368_s24 }
0x2ba1   :  { %v2031_v39 = vpop.permute.xlu0 %2030 }
0x2ba2   :  { %v2033_v40 = vmul.f32 %v5300_v34, %v2031_v39 }
0x2ba4   :  { %v2167_v42 = vrot.slane %v2033_v40, %v5691_v56 }
0x2ba6   :  { %v2168_v44 = vcombine.high %v2167_v42, %v2167_v42  ;;  %v2366_v51 = vsel %vm2311_vm3, %v2167_v42, %v5830_v60  ;;  %v2304_v53 = vrot.slane %v2167_v42, %v5694_v58 }
0x2ba7   :  { %v2368_v54 = vsel %vm2314_vm4, %v2366_v51, %v5807_v21 }
0x2ba8   :  { %v2367_v50 = vsel %vm2311_vm3, %v2168_v44, %v5834_v61  ;;  %v2344_v34 = vsel %vm2329_vm9, %v5838_v62, %v2304_v53  ;;  %v2370_v56 = vsel %vm2317_vm5, %v2368_v54, %v5785_v46  ;;  %v2308_v57 = vrot.slane %v2168_v44, %v5694_v58 }
0x2ba9   :  { %2400 = vrot.lane.b32.xlu1 %v2344_v34, %s5368_s24  ;;  %v2372_v60 = vsel %vm2320_vm6, %v2370_v56, %v5757_v11  ;;  %v2369_v21 = vsel %vm2314_vm4, %v2367_v50, %v5811_v22  ;;  %v2387_v11 = vsel %vm2320_vm6, %v2385_v27, %v5884_v33 }
0x2baa   :  { %v2374_v61 = vsel %vm2323_vm7, %v2372_v60, %v5734_v36  ;;  %v2371_v62 = vsel %vm2317_vm5, %v2369_v21, %v5789_v47  ;;  %v2345_v59 = vsel %vm2329_vm9, %v5842_v4, %v2308_v57  ;;  %v2353_v36 = vrot.slane %v5707_v1, %v5694_v58 }
0x2bab   :  { %v2376_v46 = vsel %vm2326_vm8, %v2374_v61, %v5702_v0  ;;  %v2373_v5 = vsel %vm2320_vm6, %v2371_v62, %v5761_v14  ;;  %v2389_v33 = vsel %vm2323_vm7, %v2387_v11, %v5878_v49 }
0x2bac   :  { %v2378_v22 = vsel %vm2329_vm9, %v2376_v46, %v2349_v52  ;;  %v2375_v47 = vsel %vm2323_vm7, %v2373_v5, %v5738_v37  ;;  %v2391_v1 = vsel %vm2326_vm8, %v2389_v33, %v5872_v29  ;;  %v2363_v37 = vrot.slane %v5869_v55, %v5694_v58 }
0x2bad   :  { %2414 = vrot.lane.b32.xlu0 %v2378_v22, %s5368_s24  ;;  %2404 = vrot.lane.b32.xlu1 %v2345_v59, %s5368_s24  ;;  %v2377_v0 = vsel %vm2326_vm8, %v2375_v47, %v5710_v13  ;;  %v2417_v13 = vpop.permute.xlu0 %2416 }
0x2bae   :  { %v2379_v14 = vsel %vm2329_vm9, %v2377_v0, %v2353_v36  ;;  %v2393_v4 = vsel %vm2329_vm9, %v2391_v1, %v2363_v37 }
0x2bb1   :  { %2418 = vrot.lane.b32.xlu0 %v2379_v14, %s5368_s24 }
0x2bb5   :  { %2420 = vrot.lane.b32.xlu0 %v2393_v4, %s5368_s24 }
0x2c1b   :  { %v2401_v18 = vpop.permute.xlu1 %2400 }
0x2c1c   :  { %v2428_v38 = vsel %vm2426_vm10, %v2401_v18, %v2417_v13 }
0x2c1f   :  { %v2415_v6 = vpop.permute.xlu0 %2414  ;;  %v2405_v55 = vpop.permute.xlu1 %2404 }
0x2c20   :  { %v2427_v49 = vsel %vm2426_vm10, %v2399_v20, %v2415_v6 }
0x2c21   :  { %4739 = vmatprep.mubr.msk.f32.mxu0 %vm330_vm2, %v2427_v49 }
0x2c22   :  { %4740 = vmatmul.mubr.msk.f32.vlgmr.msra.gmra.mrb[16].mxu0 %vm330_vm2, %v2428_v38 }
0x2c23   :  { %v2419_v29 = vpop.permute.xlu0 %2418 }
0x2c24   :  { %v2429_v58 = vsel %vm2426_vm10, %v2403_v7, %v2419_v29 }
0x2c25   :  { %4742 = vmatprep.mubr.msk.f32.mxu0 %vm330_vm2, %v2429_v58 }
0x2c27   :  { %v2421_v8 = vpop.permute.xlu0 %2420 }
0x2c28   :  { %v2430_v9 = vsel %vm2426_vm10, %v2405_v55, %v2421_v8 }
0x2c29   :  { %4743 = vmatmul.mubr.msk.f32.gmra.mrb[18].mxu0 %vm330_vm2, %v2430_v9 }
0x2cf5   :  { %v5996_v10 = vpop.f32.mrb[16].mxu0 }
0x2cf6   :  { %2534 = vrot.lane.b32.xlu0 %v5996_v10, %s5370_s20  ;;  %v2509_v15 = vpop.f32.mrb[17].mxu0 }
0x2cf7   :  { %2532 = vrot.lane.b32.xlu1 %v2509_v15, %s5370_s20  ;;  %4749 = vmatprep.mubr.msk.f32.mxu1 %vm2560_vm11, %v2509_v15  ;;  %v5095_v16 = vpack.i.bf16 %v5996_v10, %v2509_v15 }
0x2cfc   :  { %v6001_v19 = vpop.f32.mrb[18].mxu0 }
0x2cfd   :  { %2538 = vrot.lane.b32.xlu0 %v6001_v19, %s5370_s20  ;;  %v2519_v2 = vpop.f32.mrb[19].mxu0 }
0x2cfe   :  { %2536 = vrot.lane.b32.xlu1 %v2519_v2, %s5370_s20  ;;  %4756 = vmatprep.mubr.msk.f32.mxu0 %vm2560_vm11, %v2519_v2  ;;  %v5100_v24 = vpack.i.bf16 %v6001_v19, %v2519_v2 }
0x2d01   :  { %2542 = vrot.lane.b32.xlu0 %v5996_v10, %s5371_s21 }
0x2d02   :  { %2540 = vrot.lane.b32.xlu1 %v2509_v15, %s5371_s21 }
0x2d05   :  { %2546 = vrot.lane.b32.xlu0 %v6001_v19, %s5371_s21 }
0x2d06   :  { %2544 = vrot.lane.b32.xlu1 %v2519_v2, %s5371_s21 }
0x2d09   :  { %2550 = vrot.lane.b32.xlu0 %v5996_v10, %s5372_s22 }
0x2d0a   :  { %2548 = vrot.lane.b32.xlu1 %v2509_v15, %s5372_s22 }
0x2d0d   :  { %2554 = vrot.lane.b32.xlu0 %v6001_v19, %s5372_s22 }
0x2d0e   :  { %2552 = vrot.lane.b32.xlu1 %v2519_v2, %s5372_s22 }
0x2d11   :  { %5101 = vrot.lane.b32.xlu0 %v5100_v24, %s5373_s23 }
0x2d12   :  { %5096 = vrot.lane.b32.xlu1 %v5095_v16, %s5373_s23 }
0x2d68   :  { %v6010_v26 = vpop.permute.xlu0 %2534 }
0x2d69   :  { %v2533_v48 = vpop.permute.xlu1 %2532 }
0x2d6a   :  { %v5105_v30 = vpack.i.bf16 %v6010_v26, %v2533_v48 }
0x2d6c   :  { %5106 = vrot.lane.b32.xlu1 %v5105_v30, %s5373_s23 }
0x2d6f   :  { %v6013_v31 = vpop.permute.xlu0 %2538 }
0x2d70   :  { %v2537_v41 = vpop.permute.xlu1 %2536 }
0x2d71   :  { %v5110_v32 = vpack.i.bf16 %v6013_v31, %v2537_v41 }
0x2d73   :  { %v6016_v3 = vpop.permute.xlu0 %2542  ;;  %5111 = vrot.lane.b32.xlu0 %v5110_v32, %s5373_s23 }
0x2d74   :  { %v2541_v45 = vpop.permute.xlu1 %2540 }
0x2d75   :  { %v5115_v12 = vpack.i.bf16 %v6016_v3, %v2541_v45 }
0x2d77   :  { %v6019_v25 = vpop.permute.xlu0 %2546  ;;  %5116 = vrot.lane.b32.xlu1 %v5115_v12, %s5373_s23 }
0x2d78   :  { %v6021_v28 = vpop.permute.xlu1 %2544 }
0x2d79   :  { %v5120_v23 = vpack.i.bf16 %v6019_v25, %v6021_v28 }
0x2d7b   :  { %v6025_v17 = vpop.permute.xlu0 %2550  ;;  %5121 = vrot.lane.b32.xlu0 %v5120_v23, %s5373_s23 }
0x2d7c   :  { %v6027_v63 = vpop.permute.xlu1 %2548 }
0x2d7d   :  { %v5125_v35 = vpack.i.bf16 %v6025_v17, %v6027_v63 }
0x2d7f   :  { %v6031_v39 = vpop.permute.xlu0 %2554  ;;  %5126 = vrot.lane.b32.xlu1 %v5125_v35, %s5373_s23 }
0x2d80   :  { %v6033_v40 = vpop.permute.xlu1 %2552 }
0x2d81   :  { %v5130_v42 = vpack.i.bf16 %v6031_v39, %v6033_v40 }
0x2d83   :  { %v5102_v43 = vpop.permute.xlu0 %5101  ;;  %5136 = vrot.lane.b32.xlu1 %v5095_v16, %s5368_s24  ;;  %5131 = vrot.lane.b32.xlu0 %v5130_v42, %s5373_s23 }
0x2d84   :  { %v5104_v44 = vunpack.i.h.bf16 %v5102_v43  ;;  %v5103_v51 = vunpack.i.l.bf16 %v5102_v43  ;;  %v5097_v53 = vpop.permute.xlu1 %5096 }
0x2d85   :  { %v5099_v54 = vunpack.i.h.bf16 %v5097_v53  ;;  %v5098_v27 = vunpack.i.l.bf16 %v5097_v53 }
0x2d86   :  { %v4997_v34 = vpack.c.bf16 %v5104_v44, %v5103_v51 }
0x2d87   :  { %v4991_v56 = vpack.c.bf16 %v5099_v54, %v5098_v27  ;;  %5146 = vrot.lane.b32.xlu1 %v5105_v30, %s5368_s24  ;;  %5141 = vrot.lane.b32.xlu0 %v5100_v24, %s5368_s24 }
0x2d88   :  { %4999 = vmatprep.subr.msk.bf16.mxu0 %vm6040_vm12, %v4997_v34 }
0x2d89   :  { %4993 = vmatprep.subr.msk.bf16.mxu1 %vm6040_vm12, %v4991_v56  ;;  %5002 = vmatpush3.bf16.xpose.msk.msra.mxu0 %vm6040_vm12, %v4997_v34 }
0x2d8a   :  { %4996 = vmatpush3.bf16.xpose.msk.msra.mxu1 %vm6040_vm12, %v4991_v56 }
0x2d8b   :  { %5151 = vrot.lane.b32.xlu1 %v5115_v12, %s5368_s24  ;;  %5161 = vrot.lane.b32.xlu0 %v5110_v32, %s5368_s24 }
0x2d8f   :  { %5156 = vrot.lane.b32.xlu1 %v5125_v35, %s5368_s24  ;;  %5166 = vrot.lane.b32.xlu0 %v5120_v23, %s5368_s24 }
0x2d90   :  { %4757 = vmatmul.mubr.msk.f32.vlgmr.msra.gmra.mrb[20].mxu0 %vm2560_vm11, %v6001_v19 }
0x2d91   :  { %4750 = vmatmul.mubr.msk.f32.vlgmr.msra.gmra.mrb[20].mxu1 %vm2560_vm11, %v5996_v10  ;;  %4770 = vmatprep.mubr.msk.f32.mxu0 %vm2560_vm11, %v2537_v41 }
0x2d92   :  { %4763 = vmatprep.mubr.msk.f32.mxu1 %vm2560_vm11, %v2533_v48 }
0x2d93   :  { %5171 = vrot.lane.b32.xlu0 %v5130_v42, %s5368_s24 }
0x2dde   :  { %v5107_v57 = vpop.permute.xlu1 %5106 }
0x2ddf   :  { %v5109_v60 = vunpack.i.h.bf16 %v5107_v57  ;;  %v5108_v21 = vunpack.i.l.bf16 %v5107_v57 }
0x2de1   :  { %v5003_v52 = vpack.c.bf16 %v5109_v60, %v5108_v21 }
0x2de3   :  { %5005 = vmatprep.subr.msk.bf16.mxu1 %vm6040_vm12, %v5003_v52 }
0x2de4   :  { %5008 = vmatpush3.bf16.xpose.msk.msra.mxu1 %vm6040_vm12, %v5003_v52 }
0x2de5   :  { %v5112_v61 = vpop.permute.xlu0 %5111 }
0x2de6   :  { %v5114_v62 = vunpack.i.h.bf16 %v5112_v61  ;;  %v5113_v46 = vunpack.i.l.bf16 %v5112_v61 }
0x2de8   :  { %v5009_v5 = vpack.c.bf16 %v5114_v62, %v5113_v46 }
0x2de9   :  { %v5117_v11 = vpop.permute.xlu1 %5116 }
0x2dea   :  { %v5119_v22 = vunpack.i.h.bf16 %v5117_v11  ;;  %v5118_v59 = vunpack.i.l.bf16 %v5117_v11  ;;  %5011 = vmatprep.subr.msk.bf16.mxu0 %vm6040_vm12, %v5009_v5 }
0x2deb   :  { %4764 = vmatmul.mubr.msk.f32.vlgmr.msra.gmra.mrb[22].mxu1 %vm2560_vm11, %v6010_v26  ;;  %5014 = vmatpush3.bf16.xpose.msk.msra.mxu0 %vm6040_vm12, %v5009_v5 }
0x2dec   :  { %v5015_v36 = vpack.c.bf16 %v5119_v22, %v5118_v59  ;;  %4777 = vmatprep.mubr.msk.f32.mxu1 %vm2560_vm11, %v2541_v45 }
0x2ded   :  { %v5122_v47 = vpop.permute.xlu0 %5121 }
0x2dee   :  { %v5124_v0 = vunpack.i.h.bf16 %v5122_v47  ;;  %v5123_v14 = vunpack.i.l.bf16 %v5122_v47  ;;  %5017 = vmatprep.subr.msk.bf16.mxu1 %vm6040_vm12, %v5015_v36 }
0x2def   :  { %5020 = vmatpush3.bf16.xpose.msk.msra.mxu1 %vm6040_vm12, %v5015_v36 }
0x2df0   :  { %v5021_v33 = vpack.c.bf16 %v5124_v0, %v5123_v14 }
0x2df1   :  { %v5127_v1 = vpop.permute.xlu1 %5126 }
0x2df2   :  { %v5129_v37 = vunpack.i.h.bf16 %v5127_v1  ;;  %v5128_v4 = vunpack.i.l.bf16 %v5127_v1  ;;  %4771 = vmatmul.mubr.msk.f32.vlgmr.msra.gmra.mrb[22].mxu0 %vm2560_vm11, %v6013_v31  ;;  %5023 = vmatprep.subr.msk.bf16.mxu0 %vm6040_vm12, %v5021_v33 }
0x2df3   :  { %5026 = vmatpush3.bf16.xpose.msk.msra.mxu0 %vm6040_vm12, %v5021_v33  ;;  %4784 = vmatprep.mubr.msk.f32.mxu0 %vm2560_vm11, %v6021_v28 }
0x2df4   :  { %v5027_v20 = vpack.c.bf16 %v5129_v37, %v5128_v4 }
0x2df5   :  { %v5132_v7 = vpop.permute.xlu0 %5131  ;;  %v5137_v13 = vpop.permute.xlu1 %5136 }
0x2df6   :  { %v5134_v18 = vunpack.i.h.bf16 %v5132_v7  ;;  %v5133_v6 = vunpack.i.l.bf16 %v5132_v7  ;;  %v5139_v49 = vunpack.i.h.bf16 %v5137_v13  ;;  %v5138_v38 = vunpack.i.l.bf16 %v5137_v13  ;;  %4778 = vmatmul.mubr.msk.f32.vlgmr.msra.gmra.mrb[24].mxu1 %vm2560_vm11, %v6016_v3  ;;  %5029 = vmatprep.subr.msk.bf16.mxu1 %vm6040_vm12, %v5027_v20 }
0x2df7   :  { %5032 = vmatpush3.bf16.xpose.msk.msra.mxu1 %vm6040_vm12, %v5027_v20  ;;  %4791 = vmatprep.mubr.msk.f32.mxu1 %vm2560_vm11, %v6027_v63 }
0x2df8   :  { %v5033_v29 = vpack.c.bf16 %v5134_v18, %v5133_v6  ;;  %v5039_v58 = vpack.c.bf16 %v5139_v49, %v5138_v38 }
0x2df9   :  { %v5142_v55 = vpop.permute.xlu0 %5141  ;;  %v5147_v8 = vpop.permute.xlu1 %5146 }
0x2dfa   :  { %v5144_v9 = vunpack.i.h.bf16 %v5142_v55  ;;  %v5143_v10 = vunpack.i.l.bf16 %v5142_v55  ;;  %v5149_v15 = vunpack.i.h.bf16 %v5147_v8  ;;  %v5148_v16 = vunpack.i.l.bf16 %v5147_v8  ;;  %4785 = vmatmul.mubr.msk.f32.vlgmr.msra.gmra.mrb[24].mxu0 %vm2560_vm11, %v6019_v25  ;;  %5035 = vmatprep.subr.msk.bf16.mxu0 %vm6040_vm12, %v5033_v29 }
0x2dfb   :  { %5040 = vmatprep.subr.bf16.mxu1 %v5039_v58  ;;  %5038 = vmatpush3.bf16.xpose.msk.msra.mxu0 %vm6040_vm12, %v5033_v29 }
0x2dfc   :  { %v5047_v19 = vpack.c.bf16 %v5149_v15, %v5148_v16  ;;  %4798 = vmatprep.mubr.msk.f32.mxu0 %vm2560_vm11, %v6033_v40  ;;  %v6104_v24 = vpack.c.bf16 %v5144_v9, %v5143_v10 }
0x2dfd   :  { %v5152_v2 = vpop.permute.xlu1 %5151 }
0x2dfe   :  { %v5154_v26 = vunpack.i.h.bf16 %v5152_v2  ;;  %v5153_v48 = vunpack.i.l.bf16 %v5152_v2  ;;  %4792 = vmatmul.mubr.msk.f32.vlgmr.msra.gmra.mrb[26].mxu1 %vm2560_vm11, %v6025_v17  ;;  %5048 = vmatprep.subr.bf16.mxu0 %v5047_v19 }
0x2dff   :  { %5042 = vmatpush3.bf16.msra.mxu1 %v5039_v58 }
0x2e00   :  { %5044 = vmatprep.subr.bf16.mxu1 %v6104_v24  ;;  %v6109_v30 = vpack.c.bf16 %v5154_v26, %v5153_v48 }
0x2e02   :  { %4799 = vmatmul.mubr.msk.f32.vlgmr.msra.gmra.mrb[26].mxu0 %vm2560_vm11, %v6031_v39 }
0x2e03   :  { %5050 = vmatpush3.bf16.msra.mxu0 %v5047_v19 }
0x2e04   :  { %5056 = vmatprep.subr.bf16.mxu0 %v6109_v30 }
0x2e63   :  { %v4758_v31 = vpop.f32.mrb[20].mxu0 }
0x2e64   :  { %v4751_v41 = vpop.f32.mrb[20].mxu1  ;;  %v2722_v32 = vpop.f32.mrb[21].mxu0  ;;  %v3256_v44 = vmul.f32 0.35355338, %v4758_v31 }
0x2e65   :  { %v2635_v3 = vpop.f32.mrb[21].mxu1  ;;  %v6114_v45 = vmul.f32 0.35355338, %v4751_v41  ;;  %v6130_v51 = vmul.f32 0.35355338, %v2722_v32 }
0x2e66   :  { %v6116_v12 = vmul.f32 0.35355338, %v2635_v3  ;;  %v3285_v34 = vsel %vm2426_vm10, %v3256_v44, -inf }
0x2e67   :  { %v3284_v63 = vsel %vm2426_vm10, %v6114_v45, -inf  ;;  %v3270_v57 = vsel %vm2426_vm10, %v6130_v51, -inf }
0x2e68   :  { %v3269_v39 = vsel %vm2426_vm10, %v6116_v12, -inf }
0x2ebe   :  { %v4765_v25 = vpop.f32.mrb[22].mxu1 }
0x2ebf   :  { %v6118_v28 = vmul.f32 0.35355338, %v4765_v25  ;;  %v2809_v23 = vpop.f32.mrb[23].mxu1 }
0x2ec0   :  { %v6120_v17 = vmul.f32 0.35355338, %v2809_v23 }
0x2ec1   :  { %v3286_v35 = vsel %vm2426_vm10, %v6118_v28, -inf }
0x2ec2   :  { %v3287_v40 = vmax.f32 %v3284_v63, %v3286_v35  ;;  %v3271_v42 = vsel %vm2426_vm10, %v6120_v17, -inf }
0x2ec3   :  { %v3272_v43 = vmax.f32 %v3269_v39, %v3271_v42 }
0x2ec5   :  { %v4772_v53 = vpop.f32.mrb[22].mxu0 }
0x2ec6   :  { %v3260_v54 = vmul.f32 0.35355338, %v4772_v53  ;;  %v2896_v27 = vpop.f32.mrb[23].mxu0 }
0x2ec7   :  { %v6132_v50 = vmul.f32 0.35355338, %v2896_v27 }
0x2ec8   :  { %v3288_v56 = vsel %vm2426_vm10, %v3260_v54, -inf }
0x2ec9   :  { %v3289_v60 = vmax.f32 %v3285_v34, %v3288_v56  ;;  %v3273_v21 = vsel %vm2426_vm10, %v6132_v50, -inf  ;;  %v4779_v52 = vpop.f32.mrb[24].mxu1 }
0x2eca   :  { %v3274_v61 = vmax.f32 %v3270_v57, %v3273_v21  ;;  %v3262_v62 = vmul.f32 0.35355338, %v4779_v52  ;;  %v2983_v46 = vpop.f32.mrb[25].mxu1 }
0x2ecb   :  { %v6140_v5 = vmul.f32 0.35355338, %v2983_v46 }
0x2ecc   :  { %v3290_v11 = vsel %vm2426_vm10, %v3262_v62, -inf }
0x2ecd   :  { %v3291_v22 = vmax.f32 %v3287_v40, %v3290_v11  ;;  %v3275_v59 = vsel %vm2426_vm10, %v6140_v5, -inf  ;;  %v4786_v36 = vpop.f32.mrb[24].mxu0 }
0x2ece   :  { %v3276_v47 = vmax.f32 %v3272_v43, %v3275_v59  ;;  %v3264_v0 = vmul.f32 0.35355338, %v4786_v36  ;;  %v3070_v14 = vpop.f32.mrb[25].mxu0 }
0x2ecf   :  { %v6145_v33 = vmul.f32 0.35355338, %v3070_v14 }
0x2ed0   :  { %v3292_v1 = vsel %vm2426_vm10, %v3264_v0, -inf }
0x2ed1   :  { %v3293_v37 = vmax.f32 %v3289_v60, %v3292_v1  ;;  %v3277_v4 = vsel %vm2426_vm10, %v6145_v33, -inf  ;;  %v4793_v20 = vpop.f32.mrb[26].mxu1 }
0x2ed2   :  { %v3278_v7 = vmax.f32 %v3274_v61, %v3277_v4  ;;  %v3266_v13 = vmul.f32 0.35355338, %v4793_v20  ;;  %v3157_v18 = vpop.f32.mrb[27].mxu1 }
0x2ed3   :  { %v6150_v6 = vmul.f32 0.35355338, %v3157_v18 }
0x2ed4   :  { %v3294_v49 = vsel %vm2426_vm10, %v3266_v13, -inf }
0x2ed5   :  { %v3295_v38 = vmax.f32 %v3291_v22, %v3294_v49  ;;  %v3279_v29 = vsel %vm2426_vm10, %v6150_v6, -inf  ;;  %v4800_v58 = vpop.f32.mrb[26].mxu0 }
0x2ed6   :  { %v3280_v55 = vmax.f32 %v3276_v47, %v3279_v29  ;;  %v3268_v8 = vmul.f32 0.35355338, %v4800_v58  ;;  %v3244_v9 = vpop.f32.mrb[27].mxu0 }
0x2ed7   :  { %v6155_v10 = vmul.f32 0.35355338, %v3244_v9 }
0x2ed8   :  { %v3296_v15 = vsel %vm2426_vm10, %v3268_v8, -inf }
0x2ed9   :  { %v3297_v16 = vmax.f32 %v3293_v37, %v3296_v15  ;;  %v3281_v19 = vsel %vm2426_vm10, %v6155_v10, -inf }
0x2eda   :  { %v3282_v2 = vmax.f32 %v3278_v7, %v3281_v19 }
0x2edb   :  { %v3298_v26 = vmax.f32 %v3295_v38, %v3297_v16 }
0x2edc   :  { %v3283_v48 = vmax.f32 %v3280_v55, %v3282_v2 }
0x2edd   :  { %v3300_v31 = vsub.f32 %v6114_v45, %v3298_v26  ;;  %v3302_v41 = vsub.f32 %v3256_v44, %v3298_v26  ;;  %v3304_v32 = vsub.f32 %v6118_v28, %v3298_v26  ;;  %v3306_v3 = vsub.f32 %v3260_v54, %v3298_v26 }
0x2ede   :  { %v3308_v25 = vsub.f32 %v3262_v62, %v3298_v26  ;;  %v3310_v23 = vsub.f32 %v3264_v0, %v3298_v26  ;;  %v3312_v63 = vsub.f32 %v3266_v13, %v3298_v26  ;;  %v3314_v35 = vsub.f32 %v3268_v8, %v3298_v26 }
0x2edf   :  { %v3317_v39 = vmul.f32 1.442695, %v3300_v31  ;;  %v3321_v40 = vmul.f32 1.442695, %v3302_v41  ;;  %v3325_v42 = vmul.f32 1.442695, %v3304_v32  ;;  %v3299_v43 = vsub.f32 %v6116_v12, %v3283_v48 }
0x2ee0   :  { %v3329_v53 = vmul.f32 1.442695, %v3306_v3  ;;  %v3301_v27 = vsub.f32 %v6130_v51, %v3283_v48  ;;  %v3333_v34 = vmul.f32 1.442695, %v3308_v25  ;;  %v3337_v56 = vmul.f32 1.442695, %v3310_v23 }
0x2ee1   :  { %5303 = vpow2.f32 %v3317_v39  ;;  %v3303_v45 = vsub.f32 %v6120_v17, %v3283_v48  ;;  %v3305_v28 = vsub.f32 %v6132_v50, %v3283_v48  ;;  %v3307_v44 = vsub.f32 %v6140_v5, %v3283_v48 }
0x2ee2   :  { %5305 = vpow2.f32 %v3321_v40  ;;  %v3309_v54 = vsub.f32 %v6145_v33, %v3283_v48  ;;  %v3341_v57 = vmul.f32 1.442695, %v3312_v63  ;;  %v3311_v60 = vsub.f32 %v6150_v6, %v3283_v48 }
0x2ee3   :  { %5307 = vpow2.f32 %v3325_v42  ;;  %v3313_v12 = vsub.f32 %v6155_v10, %v3283_v48  ;;  %v3345_v51 = vmul.f32 1.442695, %v3314_v35  ;;  %v3315_v21 = vmul.f32 1.442695, %v3299_v43 }
0x2ee4   :  { %5309 = vpow2.f32 %v3329_v53  ;;  %v3319_v52 = vmul.f32 1.442695, %v3301_v27  ;;  %v3323_v17 = vmul.f32 1.442695, %v3303_v45  ;;  %v3327_v50 = vmul.f32 1.442695, %v3305_v28  ;;  %v5162_v28 = vpop.permute.xlu0 %5161 }
0x2ee5   :  { %5311 = vpow2.f32 %v3333_v34  ;;  %v3331_v61 = vmul.f32 1.442695, %v3307_v44  ;;  %v3335_v11 = vmul.f32 1.442695, %v3309_v54  ;;  %v3339_v0 = vmul.f32 1.442695, %v3311_v60 }
0x2ee6   :  { %5313 = vpow2.f32 %v3337_v56  ;;  %v3343_v4 = vmul.f32 1.442695, %v3313_v12 }
0x2ee7   :  { %5315 = vpow2.f32 %v3341_v57 }
0x2ee8   :  { %5317 = vpow2.f32 %v3345_v51 }
0x2ee9   :  { %5319 = vpow2.f32 %v3315_v21 }
0x2eea   :  { %5321 = vpow2.f32 %v3319_v52 }
0x2eeb   :  { %v5304_v62 = vpop.eup %5303  ;;  %5323 = vpow2.f32 %v3323_v17  ;;  %v5157_v17 = vpop.permute.xlu1 %5156 }
0x2eec   :  { %v5306_v46 = vpop.eup %5305  ;;  %v3362_v5 = vsel %vm2426_vm10, %v5304_v62, 0.0  ;;  %5325 = vpow2.f32 %v3327_v50  ;;  %v5167_v50 = vpop.permute.xlu0 %5166 }
0x2eed   :  { %v5308_v22 = vpop.eup %5307  ;;  %v3363_v59 = vsel %vm2426_vm10, %v5306_v46, 0.0  ;;  %5327 = vpow2.f32 %v3331_v61 }
0x2eee   :  { %v5310_v36 = vpop.eup %5309  ;;  %v3364_v47 = vadd.f32 %v3363_v59, %v3362_v5  ;;  %v3365_v33 = vsel %vm2426_vm10, %v5308_v22, 0.0  ;;  %5329 = vpow2.f32 %v3335_v11  ;;  %v5164_v5 = vunpack.i.h.bf16 %v5162_v28 }
0x2eef   :  { %v5312_v14 = vpop.eup %5311  ;;  %v3367_v7 = vsel %vm2426_vm10, %v5310_v36, 0.0  ;;  %5331 = vpow2.f32 %v3339_v0  ;;  %v5163_v11 = vunpack.i.l.bf16 %v5162_v28  ;;  %v5159_v59 = vunpack.i.h.bf16 %v5157_v17 }
0x2ef0   :  { %v5314_v1 = vpop.eup %5313  ;;  %v3366_v37 = vadd.f32 %v3365_v33, %v3364_v47  ;;  %v3369_v49 = vsel %vm2426_vm10, %v5312_v14, 0.0  ;;  %5333 = vpow2.f32 %v3343_v4  ;;  %v5158_v47 = vunpack.i.l.bf16 %v5157_v17 }
0x2ef1   :  { %v5316_v20 = vpop.eup %5315  ;;  %v3371_v8 = vsel %vm2426_vm10, %v5314_v1, 0.0 }
0x2ef2   :  { %v5318_v13 = vpop.eup %5317  ;;  %v3368_v18 = vadd.f32 %v3367_v7, %v3366_v37  ;;  %v3373_v19 = vsel %vm2426_vm10, %v5316_v20, 0.0 }
0x2ef3   :  { %v5320_v6 = vpop.eup %5319  ;;  %v3375_v41 = vsel %vm2426_vm10, %v5318_v13, 0.0 }
0x2ef4   :  { %v5322_v38 = vpop.eup %5321  ;;  %v3370_v29 = vadd.f32 %v3369_v49, %v3368_v18  ;;  %v3347_v58 = vsel %vm2426_vm10, %v5320_v6, 0.0 }
0x2ef5   :  { %v5324_v55 = vpop.eup %5323  ;;  %v3348_v9 = vsel %vm2426_vm10, %v5322_v38, 0.0 }
0x2ef6   :  { %v5326_v10 = vpop.eup %5325  ;;  %v3372_v15 = vadd.f32 %v3371_v8, %v3370_v29  ;;  %v3349_v16 = vadd.f32 %v3348_v9, %v3347_v58  ;;  %v3350_v2 = vsel %vm2426_vm10, %v5324_v55, 0.0  ;;  %v47_v58 = vld [vmem:[%s6254_s1 + $0x98] sm:$0xff] }
0x2ef7   :  { %v5328_v26 = vpop.eup %5327  ;;  %v3352_v32 = vsel %vm2426_vm10, %v5326_v10, 0.0 }
0x2ef8   :  { %v3374_v48 = vadd.f32 %v3373_v19, %v3372_v15  ;;  %v3351_v31 = vadd.f32 %v3350_v2, %v3349_v16  ;;  %v5330_v3 = vpop.eup %5329  ;;  %v3354_v63 = vsel %vm2426_vm10, %v5328_v26, 0.0 }
0x2ef9   :  { %v5332_v35 = vpop.eup %5331  ;;  %v3356_v40 = vsel %vm2426_vm10, %v5330_v3, 0.0 }
0x2efa   :  { %v3376_v25 = vadd.f32 %v3375_v41, %v3374_v48  ;;  %v3353_v23 = vadd.f32 %v3352_v32, %v3351_v31  ;;  %v5334_v42 = vpop.eup %5333  ;;  %v3358_v53 = vsel %vm2426_vm10, %v5332_v35, 0.0 }
0x2efb   :  { %v3360_v34 = vsel %vm2426_vm10, %v5334_v42, 0.0 }
0x2efc   :  { %5335 = vrcp.f32 %v3376_v25  ;;  %v3355_v39 = vadd.f32 %v3354_v63, %v3353_v23 }
0x2efe   :  { %v3357_v43 = vadd.f32 %v3356_v40, %v3355_v39 }
0x2f00   :  { %v3359_v27 = vadd.f32 %v3358_v53, %v3357_v43 }
0x2f02   :  { %v3361_v56 = vadd.f32 %v3360_v34, %v3359_v27 }
0x2f04   :  { %5337 = vrcp.f32 %v3361_v56 }
0x2f06   :  { %v5336_v45 = vpop.eup %5335 }
0x2f07   :  { %v3380_v44 = vmul.f32 %v5336_v45, %v5304_v62  ;;  %v3384_v54 = vmul.f32 %v5336_v45, %v5308_v22  ;;  %v3382_v57 = vmul.f32 %v5336_v45, %v5306_v46  ;;  %v3388_v60 = vmul.f32 %v5336_v45, %v5312_v14 }
0x2f08   :  { %v3386_v12 = vmul.f32 %v5336_v45, %v5310_v36  ;;  %v3392_v51 = vmul.f32 %v5336_v45, %v5316_v20  ;;  %v3390_v21 = vmul.f32 %v5336_v45, %v5314_v1  ;;  %v3394_v52 = vmul.f32 %v5336_v45, %v5318_v13  ;;  %v5172_v13 = vpop.permute.xlu0 %5171 }
0x2f09   :  { %v5051_v36 = vpack.c.bf16 %v5164_v5, %v5163_v11  ;;  %v5169_v14 = vunpack.i.h.bf16 %v5167_v50  ;;  %v5168_v1 = vunpack.i.l.bf16 %v5167_v50  ;;  %v5063_v20 = vpack.c.bf16 %v5159_v59, %v5158_v47 }
0x2f0a   :  { %v5173_v49 = vunpack.i.l.bf16 %v5172_v13 }
0x2f0b   :  { %v5059_v18 = vpack.c.bf16 %v5169_v14, %v5168_v1 }
0x2f0e   :  { %v5338_v61 = vpop.eup %5337 }
0x2f0f   :  { %v3379_v0 = vmul.f32 %v5338_v61, %v5320_v6  ;;  %v3383_v33 = vmul.f32 %v5338_v61, %v5324_v55  ;;  %v3381_v37 = vmul.f32 %v5338_v61, %v5322_v38  ;;  %v3387_v4 = vmul.f32 %v5338_v61, %v5328_v26  ;;  %v46_v38 = vld [vmem:[%s6254_s1 + $0x90] sm:$0xff]  ;;  %v48_v55 = vld [vmem:[%s6254_s1 + $0xa0] sm:$0xff] }
0x2f10   :  { %v3385_v7 = vmul.f32 %v5338_v61, %v5326_v10  ;;  %v3391_v62 = vmul.f32 %v5338_v61, %v5332_v35  ;;  %v3389_v22 = vmul.f32 %v5338_v61, %v5330_v3  ;;  %v3393_v46 = vmul.f32 %v5338_v61, %v5334_v42 }
0x2f11   :  { %4805 = vmatprep.mubr.msk.f32.mxu1 %vm2426_vm10, %v3379_v0  ;;  %4819 = vmatprep.mubr.msk.f32.mxu0 %vm2426_vm10, %v3383_v33  ;;  %v5174_v6 = vunpack.i.h.bf16 %v5172_v13  ;;  %v5075_v8 = vpack.c.bf16 %v48_v55, %v47_v58 }
0x2f12   :  { %4806 = vmatmul.mubr.msk.f32.vlgmr.msra.gmra.mrb[28].mxu1 %vm2426_vm10, %v3380_v44  ;;  %4820 = vmatmul.mubr.msk.f32.vlgmr.msra.gmra.mrb[28].mxu0 %vm2426_vm10, %v3384_v54 }
0x2f13   :  { %5046 = vmatpush3.bf16.msra.mxu1 %v6104_v24  ;;  %5058 = vmatpush3.bf16.msra.mxu0 %v6109_v30  ;;  %v5067_v24 = vpack.c.bf16 %v5174_v6, %v5173_v49  ;;  %v45_v30 = vld [vmem:[%s6254_s1 + $0x88] sm:$0xff]  ;;  %s5376_s1 = smov 24  }
0x2f14   :  { %4812 = vmatprep.mubr.msk.f32.mxu1 %vm2426_vm10, %v3381_v37  ;;  %5052 = vmatprep.subr.bf16.mxu1 %v5051_v36  ;;  %v5071_v29 = vpack.c.bf16 %v46_v38, %v45_v30 }
0x2f15   :  { %4833 = vmatprep.mubr.msk.f32.mxu0 %vm2426_vm10, %v3387_v4  ;;  %5064 = vmatprep.subr.bf16.mxu0 %v5063_v20 }
0x2f16   :  { %4813 = vmatmul.mubr.msk.f32.vlgmr.msra.gmra.mrb[30].mxu1 %vm2426_vm10, %v3382_v57  ;;  %4834 = vmatmul.mubr.msk.f32.vlgmr.msra.gmra.mrb[30].mxu0 %vm2426_vm10, %v3388_v60 }
0x2f17   :  { %5054 = vmatpush3.bf16.msra.mxu1 %v5051_v36  ;;  %5066 = vmatpush3.bf16.msra.mxu0 %v5063_v20 }
0x2f18   :  { %4826 = vmatprep.mubr.msk.f32.mxu1 %vm2426_vm10, %v3385_v7  ;;  %5060 = vmatprep.subr.bf16.mxu1 %v5059_v18 }
0x2f19   :  { %4847 = vmatprep.mubr.msk.f32.mxu0 %vm2426_vm10, %v3391_v62  ;;  %5072 = vmatprep.subr.bf16.mxu0 %v5071_v29 }
0x2f1a   :  { %4827 = vmatmul.mubr.msk.f32.vlgmr.msra.gmra.mrb[32].mxu1 %vm2426_vm10, %v3386_v12  ;;  %4848 = vmatmul.mubr.msk.f32.vlgmr.msra.gmra.mrb[32].mxu0 %vm2426_vm10, %v3392_v51 }
0x2f1b   :  { %5062 = vmatpush3.bf16.msra.mxu1 %v5059_v18  ;;  %4840 = vmatprep.mubr.msk.f32.mxu1 %vm2426_vm10, %v3389_v22 }
0x2f1c   :  { %5068 = vmatprep.subr.bf16.mxu1 %v5067_v24  ;;  %5074 = vmatpush3.bf16.msra.mxu0 %v5071_v29 }
0x2f1d   :  { %5076 = vmatprep.subr.bf16.mxu0 %v5075_v8 }
0x2f1e   :  { %4841 = vmatmul.mubr.msk.f32.vlgmr.msra.gmra.mrb[34].mxu1 %vm2426_vm10, %v3390_v21 }
0x2f1f   :  { %5070 = vmatpush3.bf16.msra.mxu1 %v5067_v24  ;;  %4854 = vmatprep.mubr.msk.f32.mxu1 %vm2426_vm10, %v3393_v46 }
0x2f20   :  { %5078 = vmatpush3.bf16.msra.mxu0 %v5075_v8 }
0x2f22   :  { %4855 = vmatmul.mubr.msk.f32.vlgmr.msra.gmra.mrb[36].mxu1 %vm2426_vm10, %v3394_v52 }
0x2fe5   :  { %v4807_v9 = vpop.f32.mrb[28].mxu1  ;;  %v4821_v10 = vpop.f32.mrb[28].mxu0 }
0x2fe6   :  { %4097 = vrot.lane.b32.xlu0 %v4821_v10, %s5374_s4  ;;  %v3473_v15 = vpop.f32.mrb[29].mxu1  ;;  %v3647_v16 = vpop.f32.mrb[29].mxu0 }
0x2fe7   :  { %4095 = vrot.lane.b32.xlu1 %v3647_v16, %s5374_s4 }
0x2fe9   :  { %v4814_v19 = vpop.f32.mrb[30].mxu1  ;;  %v4835_v2 = vpop.f32.mrb[30].mxu0 }
0x2fea   :  { %4113 = vrot.lane.b32.xlu0 %v4835_v2, %s5375_s5  ;;  %v3560_v26 = vpop.f32.mrb[31].mxu1  ;;  %v3821_v48 = vpop.f32.mrb[31].mxu0 }
0x2feb   :  { %4111 = vrot.lane.b32.xlu1 %v3821_v48, %s5375_s5 }
0x2fed   :  { %v4828_v31 = vpop.f32.mrb[32].mxu1  ;;  %v4849_v41 = vpop.f32.mrb[32].mxu0 }
0x2fee   :  { %4129 = vrot.lane.b32.xlu0 %v4849_v41, %s5376_s1  ;;  %v3734_v32 = vpop.f32.mrb[33].mxu1  ;;  %v3995_v3 = vpop.f32.mrb[33].mxu0 }
0x2fef   :  { %4127 = vrot.lane.b32.xlu1 %v3995_v3, %s5376_s1 }
0x2ff1   :  { %v4842_v25 = vpop.f32.mrb[34].mxu1 }
0x2ff2   :  { %4101 = vrot.lane.b32.xlu0 %v4828_v31, %s5374_s4  ;;  %v3908_v23 = vpop.f32.mrb[35].mxu1 }
0x2ff3   :  { %4099 = vrot.lane.b32.xlu1 %v3734_v32, %s5374_s4 }
0x2ff5   :  { %v4856_v63 = vpop.f32.mrb[36].mxu1 }
0x2ff6   :  { %4117 = vrot.lane.b32.xlu0 %v4842_v25, %s5375_s5  ;;  %v4082_v35 = vpop.f32.mrb[37].mxu1 }
0x2ff7   :  { %4115 = vrot.lane.b32.xlu1 %v3908_v23, %s5375_s5 }
0x2ffa   :  { %4133 = vrot.lane.b32.xlu0 %v4856_v63, %s5376_s1 }
0x2ffb   :  { %4131 = vrot.lane.b32.xlu1 %v4082_v35, %s5376_s1 }
0x3058   :  { %v4098_v39 = vpop.permute.xlu0 %4097 }
0x3059   :  { %v4096_v40 = vpop.permute.xlu1 %4095  ;;  %v4140_v34 = vsel %vm2560_vm11, %v4807_v9, %v4098_v39 }
0x305a   :  { %v4139_v53 = vsel %vm2560_vm11, %v3473_v15, %v4096_v40 }
0x305c   :  { %v4114_v42 = vpop.permute.xlu0 %4113 }
0x305d   :  { %v4112_v43 = vpop.permute.xlu1 %4111  ;;  %v4144_v28 = vsel %vm2426_vm10, %v4140_v34, %v4114_v42 }
0x305e   :  { %v4143_v56 = vsel %vm2426_vm10, %v4139_v53, %v4112_v43 }
0x3060   :  { %v4130_v27 = vpop.permute.xlu0 %4129 }
0x3061   :  { %v4128_v45 = vpop.permute.xlu1 %4127  ;;  %v4149_v54 = vsel %vm4147_vm13, %v4144_v28, %v4130_v27 }
0x3062   :  { %v4148_v44 = vsel %vm4147_vm13, %v4143_v56, %v4128_v45 }
0x3063   :  { %4865 = vmatprep.mubr.msk.f32.mxu0 %vm330_vm2, %v4148_v44 }
0x3064   :  { %4866 = vmatmul.mubr.msk.f32.vlgmr.msra.gmra.mrb[34].mxu0 %vm330_vm2, %v4149_v54  ;;  %v4102_v57 = vpop.permute.xlu0 %4101 }
0x3065   :  { %v4100_v60 = vpop.permute.xlu1 %4099  ;;  %v4142_v17 = vsel %vm2560_vm11, %v4814_v19, %v4102_v57 }
0x3066   :  { %v4141_v21 = vsel %vm2560_vm11, %v3560_v26, %v4100_v60 }
0x3068   :  { %v4118_v12 = vpop.permute.xlu0 %4117 }
0x3069   :  { %v4116_v51 = vpop.permute.xlu1 %4115  ;;  %v4146_v5 = vsel %vm2426_vm10, %v4142_v17, %v4118_v12 }
0x306a   :  { %v4145_v50 = vsel %vm2426_vm10, %v4141_v21, %v4116_v51 }
0x306c   :  { %v4134_v52 = vpop.permute.xlu0 %4133 }
0x306d   :  { %v4132_v61 = vpop.permute.xlu1 %4131  ;;  %v4151_v59 = vsel %vm4147_vm13, %v4146_v5, %v4134_v52 }
0x306e   :  { %v4150_v11 = vsel %vm4147_vm13, %v4145_v50, %v4132_v61 }
0x306f   :  { %4868 = vmatprep.mubr.msk.f32.mxu0 %vm330_vm2, %v4150_v11 }
0x3070   :  { %4869 = vmatmul.mubr.msk.f32.gmra.mrb[36].mxu0 %vm330_vm2, %v4151_v59 }
0x3137   :  { %v4867_v47 = vpop.f32.mrb[34].mxu0 }
0x3138   :  { %4250 = vst.msk [vmem:[#allocation2 + $0x8] sm:$0xff] %vm330_vm2, %v4867_v47  ;;  %v4230_v0 = vpop.f32.mrb[35].mxu0 }
0x3139   :  { %4249 = vst.msk [vmem:[#allocation2] sm:$0xff] %vm330_vm2, %v4230_v0 }
0x3143   :  { %v4870_v33 = vpop.f32.mrb[36].mxu0 }
0x3144   :  { %4252 = vst.msk [vmem:[#allocation2 + $0x18] sm:$0xff] %vm330_vm2, %v4870_v33  ;;  %v4240_v37 = vpop.f32.mrb[37].mxu0 }
0x3145   :  { %4251 = vst.msk [vmem:[#allocation2 + $0x10] sm:$0xff] %vm330_vm2, %v4240_v37 }
0x3146   :  { %5350 = shalt.err (!%p5347_p4)
}
0x3147   :  { %s5351_s11 = scalar_lea.hbm %s6255_s2, 512 }
0x3148   :  { %p5352_p5 = scmp.ne.s32.totalorder %s6255_s2, %s5351_s11  ;;  %p5355_p6 = scmp.lt.u32.totalorder %s5351_s11, %s6255_s2 }
0x314a   :  { %p5357_p7 = pnand %p5355_p6, %p5352_p5 }
0x314c   :  { %5360 = shalt.err (!%p5357_p7)
}
0x314d   :  { %s5378_s15 = smov 128  }
0x314e   :  { %4264 = dma.vmem_to_hbm [thread:$0]  %s4259_s7, 512, %s6255_s2, [#allocation3], %s5378_s15, %s5378_s15, %s5374_s4  }
0x314f   :  { %5361 = dma.done.wait [#allocation3], 512  }
0x3150   :  { %5362 = vsyncadd [#allocation3], 4294966784 }
0x3151   :  { %4268 = vsyncpa [#allocation3], 1 }

</bundles_post_ra>
